<compile_context>
chip_gen: v5e
topology: v5e:2x2
jax: 0.10.0
libtpu: 0.0.40
codegen_flags: <defaults>
</compile_context>

<pallas_src>
import functools

import jax
import jax.numpy as jnp
from jax import lax
from jax.experimental import pallas as pl
from jax.experimental.pallas import tpu as pltpu


def _round_up(x, m):
    return ((x + m - 1) // m) * m


def _pick_batch_tile(N, L):
    """Choose (TB, G): TB samples per grid step, G = N // TB grid steps.

    Prefer an even grid >= 2 (so v7x's two TensorCores both get work) and a TB
    big enough that the layer-2 matmul has ~256 rows, while bounding the
    per-step row count so VMEM intermediates stay small."""
    S = _round_up(L + 4, 8)
    best, best_key = 1, None
    for tb in range(1, N + 1):
        if N % tb or tb * S > 4096:
            continue
        g = N // tb
        key = (g >= 2 and g % 2 == 0,   # megacore-friendly grid
               g >= 2,
               min(tb * S, 256),        # fill the MXU up to ~256 rows ...
               -tb * S)                 # ... then prefer the smaller tile
        if best_key is None or key > best_key:
            best, best_key = tb, key
    return best, N // best


# ----------------------------------------------------------------------------
# Fused Pallas kernel: layer1 + layer2 + (dropout = id) + fc for TB samples
# ----------------------------------------------------------------------------

def _cnn1d_fused_kernel(x_ref, mask_ref, w1_ref, b1_ref, w2c_ref, b2_ref,
                        wfc_ref, bfc_ref, o_ref):
    # x_ref   : (R, 1)       R = TB*S stacked, zero-separated padded signals
    # mask_ref: (R, 1)       1.0 on valid pooled-layer-1 rows, 0.0 on separator
    #                        rows (doubles as layer-2's Conv1d zero padding)
    # w1_ref  : (3, 64)      layer-1 weight, BN scale folded, [tap, cout]
    # b1_ref  : (1, 64)      layer-1 fused bias (conv bias + BN shift)
    # w2c_ref : (192, 128)   layer-2 weight, BN folded, taps concatenated on K
    # b2_ref  : (1, 128)     layer-2 fused bias
    # wfc_ref : (C, S, 128)  fc weight [class, pos, channel], zero-padded to S
    # bfc_ref : (1, C)       fc bias
    # o_ref   : (TB, C)      logits for the TB samples of this grid step
    f32 = jnp.float32
    tb = o_ref.shape[0]
    s = wfc_ref.shape[1]

    def shift_up(a, k):
        # a[r] -> a[r + k], zero-filled past the end (row count preserved).
        return jnp.concatenate(
            [a[k:], jnp.zeros((k,) + a.shape[1:], a.dtype)], axis=0)

    # ---- layer1: Conv1d(1,64,3,p=1) (+BN folded) as 3 VPU FMAs + ReLU -------
    x = x_ref[...]                                            # (R, 1)
    w1 = w1_ref[...]                                          # (3, 64)
    y1 = (x * w1[0:1, :]
          + shift_up(x, 1) * w1[1:2, :]
          + shift_up(x, 2) * w1[2:3, :]) + b1_ref[...]
    y1 = jnp.maximum(y1, 0.0)                                 # (R, 64)
    # MaxPool1d(kernel=2, stride=1)
    p1 = jnp.maximum(y1, shift_up(y1, 1))                     # (R, 64)
    # Zero the inter-sample separator rows; these zero rows are exactly the
    # Conv1d(padding=1) zeros layer 2 needs, so no per-sample pad/concat.
    p1 = p1 * mask_ref[...]                                   # (R, 64)

    # ---- layer2: Conv1d(64,128,3,p=1) (+BN folded) as ONE MXU matmul --------
    # Taps concatenated along K -> a single (R, 192) @ (192, 128) matmul.
    a2 = jnp.concatenate([p1, shift_up(p1, 1), shift_up(p1, 2)], axis=1)
    z2 = jnp.dot(a2, w2c_ref[...], preferred_element_type=f32) + b2_ref[...]
    y2 = jnp.maximum(z2, 0.0)                                 # (R, 128)
    p2 = jnp.maximum(y2, shift_up(y2, 1))                     # (R, 128)

    # ---- layer3: Dropout(p=0.2) -> identity at inference --------------------
    # TODO(synk): training-mode dropout mask (pltpu.prng_random_bits) not implemented.

    # ---- fc: logits[b,o] = sum_{m,c} p2[b*S + m, c] * wfc[o, m, c] + bfc[o] -
    # S is a multiple of 8, so this reshape is a sublane-aligned split; garbage
    # rows (m >= L-2) hit zero-padded fc weights and contribute nothing.
    p2b = p2.reshape(tb, s, 128)                              # (TB, S, 128)
    prod = p2b[:, None, :, :] * wfc_ref[...][None, :, :, :]   # (TB, C, S, 128)
    acc = jnp.sum(prod, axis=2)                               # (TB, C, 128)
    logits = jnp.sum(acc, axis=2) + bfc_ref[...]              # (TB, C)
    o_ref[...] = logits


# ----------------------------------------------------------------------------
# Wrapper: BN folding, weight re-layout, sample stacking, pallas_call
# ----------------------------------------------------------------------------

def conv1d_forward(x_ncl, params, num_classes=4):
    # x_ncl: (N, 1, L) float32 -- same NCL convention as PyTorch.
    N, cin, L = x_ncl.shape
    assert cin == 1
    L2 = L - 2
    eps = 1e-5

    TB, G = _pick_batch_tile(N, L)
    S = _round_up(L + 4, 8)          # per-sample row stride (sublane aligned)
    R = TB * S

    # VMEM scaling note: the resident fc weight is num_classes*S*128*4 bytes
    # (double-buffered by the pipeline). Everything is < 1 MiB at L=32, but on
    # v7x (64 MiB physical / 32 MiB default scoped VMEM) this is the first
    # thing to blow the budget as NumSpectralPoints grows; block the fc over an
    # extra 'arbitrary' grid axis in that regime.
    assert (2 * num_classes * S * 128 * 4 + 8 * R * (64 + 192 + 128) * 4
            < 24 * 1024 * 1024), "spectral length too large: tile the fc over L"

    # Fold BatchNorm (inference) into conv weights / biases.
    s1 = params["g1"] * lax.rsqrt(params["v1"] + eps)                 # (64,)
    b1 = params["be1"] + (params["b1"] - params["m1"]) * s1
    s2 = params["g2"] * lax.rsqrt(params["v2"] + eps)                 # (128,)
    b2 = params["be2"] + (params["b2"] - params["m2"]) * s2

    w1k = (params["w1"][:, 0, :] * s1[:, None]).T                     # (3, 64)
    w2k = (params["w2"] * s2[:, None, None]).transpose(2, 1, 0)       # (3,64,128)
    w2cat = w2k.reshape(3 * 64, 128).astype(jnp.float32)              # (192,128)
    b1k = b1.reshape(1, 64).astype(jnp.float32)
    b2k = b2.reshape(1, 128).astype(jnp.float32)

    # PyTorch flattens (N, 128, L-2) in NCL order -> flat index = c * L2 + m.
    # Pre-permute to [class, pos, channel]; zero-pad pos to S so the stacked
    # activation's garbage separator rows multiply against zeros.
    wfc3 = params["wfc"].reshape(num_classes, 128, L2).transpose(0, 2, 1)
    wfc_s = jnp.pad(wfc3, ((0, 0), (0, S - L2), (0, 0))).astype(jnp.float32)
    bfc = params["bfc"].reshape(1, num_classes).astype(jnp.float32)

    # Stacked, zero-separated input: per sample S rows = [0, 0, x[0..L-1], 0..0].
    xs = jnp.zeros((N, S), jnp.float32).at[:, 2:L + 2].set(
        x_ncl[:, 0, :].astype(jnp.float32))
    xs = xs.reshape(G, R, 1)

    # Valid pooled-layer-1 rows sit at in-block indices [1, L-1].
    idx = jnp.arange(S)
    pat = ((idx >= 1) & (idx <= L - 1)).astype(jnp.float32)
    mask = jnp.tile(pat, (TB,)).reshape(R, 1)

    grid_spec = pltpu.PrefetchScalarGridSpec(
        num_scalar_prefetch=0,
        grid=(G,),
        in_specs=[
            pl.BlockSpec((None, R, 1), lambda g: (g, 0, 0)),
            pl.BlockSpec((R, 1), lambda g: (0, 0)),
            pl.BlockSpec((3, 64), lambda g: (0, 0)),
            pl.BlockSpec((1, 64), lambda g: (0, 0)),
            pl.BlockSpec((192, 128), lambda g: (0, 0)),
            pl.BlockSpec((1, 128), lambda g: (0, 0)),
            pl.BlockSpec((num_classes, S, 128), lambda g: (0, 0, 0)),
            pl.BlockSpec((1, num_classes), lambda g: (0, 0)),
        ],
        out_specs=pl.BlockSpec((None, TB, num_classes), lambda g: (g, 0, 0)),
    )

    out = pl.pallas_call(
        _cnn1d_fused_kernel,
        out_shape=jax.ShapeDtypeStruct((G, TB, num_classes), jnp.float32),
        grid_spec=grid_spec,
        compiler_params=pltpu.CompilerParams(
            dimension_semantics=("parallel",),     # megacore split on v7x
            vmem_limit_bytes=32 * 1024 * 1024,     # safe on v5e/v6e/v7x
        ),
    )(xs, mask, w1k.astype(jnp.float32), b1k, w2cat, b2k, wfc_s, bfc)

    return out.reshape(N, num_classes)                                # (N, C)


# ----------------------------------------------------------------------------
# Pure-JAX reference (mirrors the PyTorch module) + parameter init
# ----------------------------------------------------------------------------

def _reference_forward(x_ncl, params, num_classes=4, eps=1e-5):
    def conv_bn_relu_pool(x, w, b, g, be, m, v):
        y = lax.conv_general_dilated(x, w, window_strides=(1,), padding=[(1, 1)],
                                     dimension_numbers=("NCH", "OIH", "NCH"))
        y = y + b[None, :, None]
        y = (y - m[None, :, None]) * (g / jnp.sqrt(v + eps))[None, :, None] \
            + be[None, :, None]
        y = jnp.maximum(y, 0.0)
        return jnp.maximum(y[:, :, :-1], y[:, :, 1:])

    o = conv_bn_relu_pool(x_ncl, params["w1"], params["b1"], params["g1"],
                          params["be1"], params["m1"], params["v1"])
    o = conv_bn_relu_pool(o, params["w2"], params["b2"], params["g2"],
                          params["be2"], params["m2"], params["v2"])
    flat = o.reshape(o.shape[0], -1)
    return flat @ params["wfc"].T + params["bfc"][None, :]


def init_params(key, L, num_classes=4):
    ks = jax.random.split(key, 14)
    p = {}
    p["w1"] = 0.2 * jax.random.normal(ks[0], (64, 1, 3), jnp.float32)
    p["b1"] = 0.05 * jax.random.normal(ks[1], (64,), jnp.float32)
    p["g1"] = 1.0 + 0.1 * jax.random.normal(ks[2], (64,), jnp.float32)
    p["be1"] = 0.05 * jax.random.normal(ks[3], (64,), jnp.float32)
    p["m1"] = 0.1 * jax.random.normal(ks[4], (64,), jnp.float32)
    p["v1"] = jax.random.uniform(ks[5], (64,), jnp.float32, 0.5, 1.5)
    p["w2"] = 0.05 * jax.random.normal(ks[6], (128, 64, 3), jnp.float32)
    p["b2"] = 0.05 * jax.random.normal(ks[7], (128,), jnp.float32)
    p["g2"] = 1.0 + 0.1 * jax.random.normal(ks[8], (128,), jnp.float32)
    p["be2"] = 0.05 * jax.random.normal(ks[9], (128,), jnp.float32)
    p["m2"] = 0.05 * jax.random.normal(ks[10], (128,), jnp.float32)
    p["v2"] = jax.random.uniform(ks[11], (128,), jnp.float32, 0.5, 1.5)
    F = 128 * (L - 2)
    p["wfc"] = 0.02 * jax.random.normal(ks[12], (num_classes, F), jnp.float32)
    p["bfc"] = 0.02 * jax.random.normal(ks[13], (num_classes,), jnp.float32)
    return p


# ----------------------------------------------------------------------------
# Main
# ----------------------------------------------------------------------------

if __name__ == "__main__":
    key = jax.random.PRNGKey(0)
    k_x, k_p = jax.random.split(key)

    N = 8            # batch -> TB=4 samples/step, grid=(2,) (even, megacore)
    L = 32           # NumSpectralPoints (small synthetic value)
    NUM_CLASSES = 4

    x = jax.random.normal(k_x, (N, 1, L), jnp.float32)   # NCL, like PyTorch
    params = init_params(k_p, L, NUM_CLASSES)

    fwd = jax.jit(functools.partial(conv1d_forward, num_classes=NUM_CLASSES))
    out = jax.block_until_ready(fwd(x, params))

    assert out.shape == (N, NUM_CLASSES), out.shape
    assert out.dtype == jnp.float32
    assert bool(jnp.all(jnp.isfinite(out)))

    # Cross-check against a pure-JAX reference of the PyTorch forward.
    ref = _reference_forward(x, params, NUM_CLASSES)
    max_err = float(jnp.max(jnp.abs(out - ref)))
    assert max_err < 3e-2, max_err

    print("KERNEL_OK")
</pallas_src>

<mosaic_0001>
module attributes {stable_mosaic.version = 11 : i64} {
  func.func @_cnn1d_fused_kernel(%arg0: i32, %arg1: memref<1x160x1xf32, #tpu.memory_space<vmem>>, %arg2: memref<160x1xf32, #tpu.memory_space<vmem>>, %arg3: memref<3x64xf32, #tpu.memory_space<vmem>>, %arg4: memref<1x64xf32, #tpu.memory_space<vmem>>, %arg5: memref<192x128xf32, #tpu.memory_space<vmem>>, %arg6: memref<1x128xf32, #tpu.memory_space<vmem>>, %arg7: memref<4x40x128xf32, #tpu.memory_space<vmem>>, %arg8: memref<1x4xf32, #tpu.memory_space<vmem>>, %arg9: memref<1x4x4xf32, #tpu.memory_space<vmem>>) attributes {dimension_semantics = [#tpu.dimension_semantics<parallel>], iteration_bounds = array<i64: 2>, scalar_prefetch = 0 : i64, scratch_operands = 0 : i64, tpu.core_type = #tpu.core_type<tc>, window_params = [{transform_indices = @transform_0, window_bounds = array<i64: 1, 160, 1>}, {pipeline_mode = #tpu.pipeline_mode<synchronous>, transform_indices = @transform_1, window_bounds = array<i64: 160, 1>}, {pipeline_mode = #tpu.pipeline_mode<synchronous>, transform_indices = @transform_2, window_bounds = array<i64: 3, 64>}, {pipeline_mode = #tpu.pipeline_mode<synchronous>, transform_indices = @transform_3, window_bounds = array<i64: 1, 64>}, {pipeline_mode = #tpu.pipeline_mode<synchronous>, transform_indices = @transform_4, window_bounds = array<i64: 192, 128>}, {pipeline_mode = #tpu.pipeline_mode<synchronous>, transform_indices = @transform_5, window_bounds = array<i64: 1, 128>}, {pipeline_mode = #tpu.pipeline_mode<synchronous>, transform_indices = @transform_6, window_bounds = array<i64: 4, 40, 128>}, {pipeline_mode = #tpu.pipeline_mode<synchronous>, transform_indices = @transform_7, window_bounds = array<i64: 1, 4>}, {transform_indices = @transform_8, window_bounds = array<i64: 1, 4, 4>}]} {
    %c0 = arith.constant 0 : index
    %c0_0 = arith.constant 0 : index
    %c0_1 = arith.constant 0 : index
    %0 = vector.load %arg1[%c0, %c0_0, %c0_1] : memref<1x160x1xf32, #tpu.memory_space<vmem>>, vector<1x160x1xf32>
    %1 = vector.shape_cast %0 : vector<1x160x1xf32> to vector<160x1xf32>
    %c0_2 = arith.constant 0 : index
    %c0_3 = arith.constant 0 : index
    %2 = vector.load %arg3[%c0_2, %c0_3] : memref<3x64xf32, #tpu.memory_space<vmem>>, vector<3x64xf32>
    %3 = vector.extract_strided_slice %2 {offsets = [0, 0], sizes = [1, 64], strides = [1, 1]} : vector<3x64xf32> to vector<1x64xf32>
    %4 = vector.broadcast %1 : vector<160x1xf32> to vector<160x64xf32>
    %5 = vector.broadcast %3 : vector<1x64xf32> to vector<160x64xf32>
    %6 = arith.mulf %4, %5 : vector<160x64xf32>
    %7 = vector.extract_strided_slice %1 {offsets = [1, 0], sizes = [159, 1], strides = [1, 1]} : vector<160x1xf32> to vector<159x1xf32>
    %cst = arith.constant 0.000000e+00 : f32
    %8 = vector.broadcast %cst : f32 to vector<1x1xf32>
    %9 = tpu.concatenate %7, %8 in 0 : vector<159x1xf32>, vector<1x1xf32> -> vector<160x1xf32>
    %10 = vector.extract_strided_slice %2 {offsets = [1, 0], sizes = [1, 64], strides = [1, 1]} : vector<3x64xf32> to vector<1x64xf32>
    %11 = vector.broadcast %9 : vector<160x1xf32> to vector<160x64xf32>
    %12 = vector.broadcast %10 : vector<1x64xf32> to vector<160x64xf32>
    %13 = arith.mulf %11, %12 : vector<160x64xf32>
    %14 = arith.addf %6, %13 : vector<160x64xf32>
    %15 = vector.extract_strided_slice %1 {offsets = [2, 0], sizes = [158, 1], strides = [1, 1]} : vector<160x1xf32> to vector<158x1xf32>
    %cst_4 = arith.constant 0.000000e+00 : f32
    %16 = vector.broadcast %cst_4 : f32 to vector<2x1xf32>
    %17 = tpu.concatenate %15, %16 in 0 : vector<158x1xf32>, vector<2x1xf32> -> vector<160x1xf32>
    %18 = vector.extract_strided_slice %2 {offsets = [2, 0], sizes = [1, 64], strides = [1, 1]} : vector<3x64xf32> to vector<1x64xf32>
    %19 = vector.broadcast %17 : vector<160x1xf32> to vector<160x64xf32>
    %20 = vector.broadcast %18 : vector<1x64xf32> to vector<160x64xf32>
    %21 = arith.mulf %19, %20 : vector<160x64xf32>
    %22 = arith.addf %14, %21 : vector<160x64xf32>
    %c0_5 = arith.constant 0 : index
    %c0_6 = arith.constant 0 : index
    %23 = vector.load %arg4[%c0_5, %c0_6] : memref<1x64xf32, #tpu.memory_space<vmem>>, vector<1x64xf32>
    %24 = vector.broadcast %23 : vector<1x64xf32> to vector<160x64xf32>
    %25 = arith.addf %22, %24 : vector<160x64xf32>
    %cst_7 = arith.constant 0.000000e+00 : f32
    %26 = vector.broadcast %cst_7 : f32 to vector<160x64xf32>
    %27 = arith.maximumf %25, %26 : vector<160x64xf32>
    %28 = vector.extract_strided_slice %27 {offsets = [1, 0], sizes = [159, 64], strides = [1, 1]} : vector<160x64xf32> to vector<159x64xf32>
    %cst_8 = arith.constant 0.000000e+00 : f32
    %29 = vector.broadcast %cst_8 : f32 to vector<1x64xf32>
    %30 = tpu.concatenate %28, %29 in 0 : vector<159x64xf32>, vector<1x64xf32> -> vector<160x64xf32>
    %31 = arith.maximumf %27, %30 : vector<160x64xf32>
    %c0_9 = arith.constant 0 : index
    %c0_10 = arith.constant 0 : index
    %32 = vector.load %arg2[%c0_9, %c0_10] : memref<160x1xf32, #tpu.memory_space<vmem>>, vector<160x1xf32>
    %33 = vector.broadcast %32 : vector<160x1xf32> to vector<160x64xf32>
    %34 = arith.mulf %31, %33 : vector<160x64xf32>
    %35 = vector.extract_strided_slice %34 {offsets = [1, 0], sizes = [159, 64], strides = [1, 1]} : vector<160x64xf32> to vector<159x64xf32>
    %cst_11 = arith.constant 0.000000e+00 : f32
    %36 = vector.broadcast %cst_11 : f32 to vector<1x64xf32>
    %37 = tpu.concatenate %35, %36 in 0 : vector<159x64xf32>, vector<1x64xf32> -> vector<160x64xf32>
    %38 = vector.extract_strided_slice %34 {offsets = [2, 0], sizes = [158, 64], strides = [1, 1]} : vector<160x64xf32> to vector<158x64xf32>
    %cst_12 = arith.constant 0.000000e+00 : f32
    %39 = vector.broadcast %cst_12 : f32 to vector<2x64xf32>
    %40 = tpu.concatenate %38, %39 in 0 : vector<158x64xf32>, vector<2x64xf32> -> vector<160x64xf32>
    %41 = tpu.concatenate %34, %37, %40 in 1 : vector<160x64xf32>, vector<160x64xf32>, vector<160x64xf32> -> vector<160x192xf32>
    %c0_13 = arith.constant 0 : index
    %c0_14 = arith.constant 0 : index
    %42 = vector.load %arg5[%c0_13, %c0_14] : memref<192x128xf32, #tpu.memory_space<vmem>>, vector<192x128xf32>
    %cst_15 = arith.constant dense<0.000000e+00> : vector<160x128xf32>
    %43 = tpu.matmul %41, %42, %cst_15 {dimension_numbers = #tpu.dot_dimension_numbers<[1], [0], [0], [1], [0, 0, 1, 1], [], []>} : vector<160x192xf32>, vector<192x128xf32>, vector<160x128xf32> -> vector<160x128xf32>
    %c0_16 = arith.constant 0 : index
    %c0_17 = arith.constant 0 : index
    %44 = vector.load %arg6[%c0_16, %c0_17] : memref<1x128xf32, #tpu.memory_space<vmem>>, vector<1x128xf32>
    %45 = vector.broadcast %44 : vector<1x128xf32> to vector<160x128xf32>
    %46 = arith.addf %43, %45 : vector<160x128xf32>
    %cst_18 = arith.constant 0.000000e+00 : f32
    %47 = vector.broadcast %cst_18 : f32 to vector<160x128xf32>
    %48 = arith.maximumf %46, %47 : vector<160x128xf32>
    %49 = vector.extract_strided_slice %48 {offsets = [1, 0], sizes = [159, 128], strides = [1, 1]} : vector<160x128xf32> to vector<159x128xf32>
    %cst_19 = arith.constant 0.000000e+00 : f32
    %50 = vector.broadcast %cst_19 : f32 to vector<1x128xf32>
    %51 = tpu.concatenate %49, %50 in 0 : vector<159x128xf32>, vector<1x128xf32> -> vector<160x128xf32>
    %52 = arith.maximumf %48, %51 : vector<160x128xf32>
    %53 = vector.shape_cast %52 : vector<160x128xf32> to vector<4x40x128xf32>
    %54 = vector.shape_cast %53 : vector<4x40x128xf32> to vector<4x1x40x128xf32>
    %c0_20 = arith.constant 0 : index
    %c0_21 = arith.constant 0 : index
    %c0_22 = arith.constant 0 : index
    %55 = vector.load %arg7[%c0_20, %c0_21, %c0_22] : memref<4x40x128xf32, #tpu.memory_space<vmem>>, vector<4x40x128xf32>
    %56 = vector.shape_cast %55 : vector<4x40x128xf32> to vector<1x4x40x128xf32>
    %57 = vector.broadcast %54 : vector<4x1x40x128xf32> to vector<4x4x40x128xf32>
    %58 = vector.broadcast %56 : vector<1x4x40x128xf32> to vector<4x4x40x128xf32>
    %59 = arith.mulf %57, %58 : vector<4x4x40x128xf32>
    %cst_23 = arith.constant dense<0.000000e+00> : vector<4x4x128xf32>
    %60 = vector.multi_reduction <add>, %59, %cst_23 [2] : vector<4x4x40x128xf32> to vector<4x4x128xf32>
    %cst_24 = arith.constant dense<0.000000e+00> : vector<4x4xf32>
    %61 = vector.multi_reduction <add>, %60, %cst_24 [2] : vector<4x4x128xf32> to vector<4x4xf32>
    %c0_25 = arith.constant 0 : index
    %c0_26 = arith.constant 0 : index
    %62 = vector.load %arg8[%c0_25, %c0_26] : memref<1x4xf32, #tpu.memory_space<vmem>>, vector<1x4xf32>
    %63 = vector.broadcast %62 : vector<1x4xf32> to vector<4x4xf32>
    %64 = arith.addf %61, %63 : vector<4x4xf32>
    %c0_27 = arith.constant 0 : index
    %c0_28 = arith.constant 0 : index
    %c0_29 = arith.constant 0 : index
    %65 = vector.load %arg9[%c0_27, %c0_28, %c0_29] : memref<1x4x4xf32, #tpu.memory_space<vmem>>, vector<1x4x4xf32>
    %66 = vector.shape_cast %65 : vector<1x4x4xf32> to vector<4x4xf32>
    %67 = vector.shape_cast %64 : vector<4x4xf32> to vector<1x4x4xf32>
    tpu.vector_store %arg9[%c0_27, %c0_28, %c0_29], %67 {strides = array<i32>} : memref<1x4x4xf32, #tpu.memory_space<vmem>>, vector<1x4x4xf32>,
    return
  }
  func.func @transform_0(%arg0: i32) -> (i32, i32, i32) {
    %c0_i32 = arith.constant 0 : i32
    %c0_i32_0 = arith.constant 0 : i32
    %c0_i32_1 = arith.constant 0 : i32
    return %arg0, %c0_i32, %c0_i32_0 : i32, i32, i32
  }
  func.func @transform_1(%arg0: i32) -> (i32, i32) {
    %c0_i32 = arith.constant 0 : i32
    %c0_i32_0 = arith.constant 0 : i32
    %c0_i32_1 = arith.constant 0 : i32
    return %c0_i32, %c0_i32_0 : i32, i32
  }
  func.func @transform_2(%arg0: i32) -> (i32, i32) {
    %c0_i32 = arith.constant 0 : i32
    %c0_i32_0 = arith.constant 0 : i32
    %c0_i32_1 = arith.constant 0 : i32
    return %c0_i32, %c0_i32_0 : i32, i32
  }
  func.func @transform_3(%arg0: i32) -> (i32, i32) {
    %c0_i32 = arith.constant 0 : i32
    %c0_i32_0 = arith.constant 0 : i32
    %c0_i32_1 = arith.constant 0 : i32
    return %c0_i32, %c0_i32_0 : i32, i32
  }
  func.func @transform_4(%arg0: i32) -> (i32, i32) {
    %c0_i32 = arith.constant 0 : i32
    %c0_i32_0 = arith.constant 0 : i32
    %c0_i32_1 = arith.constant 0 : i32
    return %c0_i32, %c0_i32_0 : i32, i32
  }
  func.func @transform_5(%arg0: i32) -> (i32, i32) {
    %c0_i32 = arith.constant 0 : i32
    %c0_i32_0 = arith.constant 0 : i32
    %c0_i32_1 = arith.constant 0 : i32
    return %c0_i32, %c0_i32_0 : i32, i32
  }
  func.func @transform_6(%arg0: i32) -> (i32, i32, i32) {
    %c0_i32 = arith.constant 0 : i32
    %c0_i32_0 = arith.constant 0 : i32
    %c0_i32_1 = arith.constant 0 : i32
    %c0_i32_2 = arith.constant 0 : i32
    return %c0_i32, %c0_i32_0, %c0_i32_1 : i32, i32, i32
  }
  func.func @transform_7(%arg0: i32) -> (i32, i32) {
    %c0_i32 = arith.constant 0 : i32
    %c0_i32_0 = arith.constant 0 : i32
    %c0_i32_1 = arith.constant 0 : i32
    return %c0_i32, %c0_i32_0 : i32, i32
  }
  func.func @transform_8(%arg0: i32) -> (i32, i32, i32) {
    %c0_i32 = arith.constant 0 : i32
    %c0_i32_0 = arith.constant 0 : i32
    %c0_i32_1 = arith.constant 0 : i32
    return %arg0, %c0_i32, %c0_i32_0 : i32, i32, i32
  }
}

</mosaic_0001>

<bundles_post_ra>
// kernel: tile.8
= control target key start
LH: loop header
LB: loop body
LE: loop exit
PB: predicated region body
PF: predicated region fallthrough
CT: control target
= control target key end

     0   :  { %s22_s0 = inlined_call_operand.vmem [shape: f32[40], index: 0, kind: input, shape index: {}]   ;;  %s23_s1 = inlined_call_operand.vmem [shape: f32[4,40], index: 1, kind: output, shape index: {}]  }
   0x1   :  { %v4_v0 = vld [vmem:[%s22_s0] ss:$0 sm:$0xff] }
   0x2   :  { %5 = vst [vmem:[%s23_s1] sm:$0xf] %v4_v0 }

// kernel: tile.0
= control target key start
LH: loop header
LB: loop body
LE: loop exit
PB: predicated region body
PF: predicated region fallthrough
CT: control target
= control target key end

     0   :  { %s394_s8 = smov 127   ;;  %s395_s9 = smov 123   ;;  %vm7_vm0 = vcmask 7168   ;;  %s701_s0 = inlined_call_operand.vmem [shape: f32[4,40], index: 0, kind: input, shape index: {}]   ;;  %s702_s1 = inlined_call_operand.vmem [shape: f32[160,1], index: 1, kind: output, shape index: {}]  }
   0x1   :  { %v4_v0 = vld [vmem:[%s701_s0] sm:$0xf]  ;;  %s393_s0 = smov 125   ;;  %s396_s10 = smov 124  }
   0x2   :  { %5 = vst [vmem:[#allocation0] sm:$0xf] %v4_v0  ;;  %s397_s11 = smov 126   ;;  %s398_s12 = smov 122  }
   0x3   :  { %s399_s13 = smov 120   ;;  %s400_s14 = smov 121  }
   0x4   :  { %s401_s15 = smov 119   ;;  %s402_s16 = smov 117  }
   0x5   :  { %s403_s17 = smov 118   ;;  %s404_s18 = smov 116  }
   0x6   :  { %s405_s19 = smov 114   ;;  %s406_s20 = smov 115  }
   0x7   :  { %s407_s21 = smov 113   ;;  %s408_s22 = smov 111  }
   0x8   :  { %s409_s23 = smov 112   ;;  %s410_s24 = smov 110  }
   0x9   :  { %v21_v1 = vld [vmem:[#allocation0] sm:$0xf]   ;;  %s411_s25 = smov 108   ;;  %s412_s26 = smov 109  }
   0xa   :  { %v9_v2 = vld [vmem:[#allocation0] sm:$0xf]   ;;  %22 = vrot.lane.b32.xlu1 %v21_v1, %s393_s0  ;;  %s413_s27 = smov 107   ;;  %s414_s28 = smov 105  }
   0xb   :  { %10 = vrot.lane.b32.xlu0 %v9_v2, %s394_s8  ;;  %v33_v3 = vld [vmem:[#allocation0] sm:$0xf]   ;;  %s415_s29 = smov 106   ;;  %s416_s30 = smov 104  }
   0xc   :  { %34 = vrot.lane.b32.xlu2 %v33_v3, %s395_s9  ;;  %v27_v4 = vld [vmem:[#allocation0] sm:$0xf]   ;;  %s417_s2 = smov 102   ;;  %s418_s3 = smov 103  }
   0xd   :  { %v15_v5 = vld [vmem:[#allocation0] sm:$0xf]   ;;  %s419_s4 = smov 101   ;;  %s420_s5 = smov 99  }
   0xe   :  { %v39_v6 = vld [vmem:[#allocation0] sm:$0xf]   ;;  %s421_s6 = smov 100   ;;  %s422_s7 = smov 98  }
   0xf   :  { %v51_v7 = vld.sshfl [vmem:[#allocation0] sm:$0xff pattern:$0x22222103]   ;;  %s423_s0 = smov 96   ;;  %s424_s8 = smov 97  }
  0x10   :  { %v45_v8 = vld [vmem:[#allocation0] sm:$0xf]   ;;  %s425_s9 = smov 95  }
  0x11   :  { %v123_v9 = vld.sshfl [vmem:[#allocation0] sm:$0xff pattern:$0x11111032]  }
  0x12   :  { %28 = vrot.lane.b32.xlu1 %v27_v4, %s396_s10  ;;  %v195_v10 = vld.sshfl [vmem:[#allocation0] sm:$0xff pattern:$0x321]   ;;  %s426_s10 = smov 93  }
  0x13   :  { %16 = vrot.lane.b32.xlu0 %v15_v5, %s397_s11  ;;  %v243_v11 = vld [vmem:[#allocation0] sm:$0xf]   ;;  %s427_s11 = smov 94  }
  0x14   :  { %40 = vrot.lane.b32.xlu2 %v39_v6, %s398_s12  ;;  %v249_v12 = vld [vmem:[#allocation0] sm:$0xf]   ;;  %s428_s12 = smov 92  }
  0x15   :  { %v261_v13 = vld [vmem:[#allocation0] sm:$0xf]  }
  0x16   :  { %v255_v14 = vld [vmem:[#allocation0] sm:$0xf]  }
  0x17   :  { %v267_v15 = vld [vmem:[#allocation0] sm:$0xf]  }
  0x18   :  { %v279_v16 = vld [vmem:[#allocation0] sm:$0xf]  }
  0x19   :  { %v273_v18 = vld [vmem:[#allocation0] sm:$0xf]  }
  0x1a   :  { %52 = vrot.lane.b32.xlu1 %v51_v7, %s399_s13  ;;  %v285_v19 = vld [vmem:[#allocation0] sm:$0xf]  }
  0x1b   :  { %46 = vrot.lane.b32.xlu0 %v45_v8, %s400_s14  ;;  %v6_v49 = vld [vmem:[#allocation0] sm:$0xf]  }
  0x1c   :  { %60 = vrot.lane.b32.xlu2 %v51_v7, %s401_s15  ;;  %s429_s15 = smov 90   ;;  %8 = vst.msk [vmem:[%s702_s1] ss:$40 sm:$0xf] %vm7_vm0, %v6_v49  }
  0x22   :  { %76 = vrot.lane.b32.xlu1 %v51_v7, %s402_s16  ;;  %s430_s16 = smov 91  }
  0x23   :  { %68 = vrot.lane.b32.xlu0 %v51_v7, %s403_s17  ;;  %s431_s17 = smov 89  }
  0x24   :  { %84 = vrot.lane.b32.xlu2 %v51_v7, %s404_s18 }
  0x2a   :  { %100 = vrot.lane.b32.xlu1 %v51_v7, %s405_s19 }
  0x2b   :  { %92 = vrot.lane.b32.xlu0 %v51_v7, %s406_s20 }
  0x2c   :  { %108 = vrot.lane.b32.xlu2 %v51_v7, %s407_s21 }
  0x32   :  { %124 = vrot.lane.b32.xlu1 %v123_v9, %s408_s22 }
  0x33   :  { %116 = vrot.lane.b32.xlu0 %v123_v9, %s409_s23 }
  0x34   :  { %132 = vrot.lane.b32.xlu2 %v123_v9, %s410_s24 }
  0x3a   :  { %148 = vrot.lane.b32.xlu1 %v123_v9, %s411_s25 }
  0x3b   :  { %140 = vrot.lane.b32.xlu0 %v123_v9, %s412_s26 }
  0x3c   :  { %156 = vrot.lane.b32.xlu2 %v123_v9, %s413_s27 }
  0x42   :  { %172 = vrot.lane.b32.xlu1 %v123_v9, %s414_s28 }
  0x43   :  { %164 = vrot.lane.b32.xlu0 %v123_v9, %s415_s29 }
  0x44   :  { %180 = vrot.lane.b32.xlu2 %v195_v10, %s416_s30 }
  0x4a   :  { %196 = vrot.lane.b32.xlu1 %v195_v10, %s417_s2 }
  0x4b   :  { %188 = vrot.lane.b32.xlu0 %v195_v10, %s418_s3 }
  0x4c   :  { %204 = vrot.lane.b32.xlu2 %v195_v10, %s419_s4 }
  0x52   :  { %220 = vrot.lane.b32.xlu1 %v195_v10, %s420_s5 }
  0x53   :  { %212 = vrot.lane.b32.xlu0 %v195_v10, %s421_s6 }
  0x54   :  { %228 = vrot.lane.b32.xlu2 %v195_v10, %s422_s7 }
  0x5a   :  { %244 = vrot.lane.b32.xlu1 %v243_v11, %s423_s0 }
  0x5b   :  { %236 = vrot.lane.b32.xlu0 %v195_v10, %s424_s8 }
  0x5c   :  { %250 = vrot.lane.b32.xlu2 %v249_v12, %s425_s9 }
  0x62   :  { %262 = vrot.lane.b32.xlu1 %v261_v13, %s426_s10 }
  0x63   :  { %256 = vrot.lane.b32.xlu0 %v255_v14, %s427_s11 }
  0x64   :  { %268 = vrot.lane.b32.xlu2 %v267_v15, %s428_s12 }
  0x66   :  { %v35_v17 = vpop.permute.xlu2 %34  }
  0x67   :  { %295 = vst.msk [vmem:[%s702_s1 + $0x5] ss:$40 sm:$0xf] %vm7_vm0, %v35_v17  }
  0x6a   :  { %280 = vrot.lane.b32.xlu1 %v279_v16, %s429_s15 }
  0x6b   :  { %274 = vrot.lane.b32.xlu0 %v273_v18, %s430_s16 }
  0x6c   :  { %286 = vrot.lane.b32.xlu2 %v285_v19, %s431_s17 }
  0x6e   :  { %v41_v20 = vpop.permute.xlu2 %40  }
  0x6f   :  { %296 = vst.msk [vmem:[%s702_s1 + $0x6] ss:$40 sm:$0xf] %vm7_vm0, %v41_v20  }
  0x76   :  { %v61_v21 = vpop.permute.xlu2 %60  }
  0x77   :  { %300 = vst.msk [vmem:[%s702_s1 + $0x81] ss:$-120 sm:$0x3] %vm7_vm0, %v61_v21  }
  0x78   :  { %301 = vst.msk [vmem:[%s702_s1 - $0x1f] ss:$40 sm:$0xc] %vm7_vm0, %v61_v21  }
  0x7c   :  { %v23_v22 = vpop.permute.xlu1 %22  }
  0x7d   :  { %v11_v23 = vpop.permute.xlu0 %10   ;;  %293 = vst.msk [vmem:[%s702_s1 + $0x3] ss:$40 sm:$0xf] %vm7_vm0, %v23_v22  }
  0x7e   :  { %291 = vst.msk [vmem:[%s702_s1 + $0x1] ss:$40 sm:$0xf] %vm7_vm0, %v11_v23   ;;  %v85_v24 = vpop.permute.xlu2 %84  }
  0x7f   :  { %306 = vst.msk [vmem:[%s702_s1 + $0x84] ss:$-120 sm:$0x3] %vm7_vm0, %v85_v24  }
  0x80   :  { %307 = vst.msk [vmem:[%s702_s1 - $0x1c] ss:$40 sm:$0xc] %vm7_vm0, %v85_v24  }
  0x84   :  { %v29_v25 = vpop.permute.xlu1 %28  }
  0x85   :  { %v17_v26 = vpop.permute.xlu0 %16   ;;  %294 = vst.msk [vmem:[%s702_s1 + $0x4] ss:$40 sm:$0xf] %vm7_vm0, %v29_v25  }
  0x86   :  { %292 = vst.msk [vmem:[%s702_s1 + $0x2] ss:$40 sm:$0xf] %vm7_vm0, %v17_v26   ;;  %v109_v27 = vpop.permute.xlu2 %108  }
  0x87   :  { %312 = vst.msk [vmem:[%s702_s1 + $0x87] ss:$-120 sm:$0x3] %vm7_vm0, %v109_v27  }
  0x88   :  { %313 = vst.msk [vmem:[%s702_s1 - $0x19] ss:$40 sm:$0xc] %vm7_vm0, %v109_v27  }
  0x8c   :  { %v53_v28 = vpop.permute.xlu1 %52  }
  0x8d   :  { %v47_v29 = vpop.permute.xlu0 %46   ;;  %298 = vst.msk [vmem:[%s702_s1 + $0x80] ss:$-120 sm:$0x3] %vm7_vm0, %v53_v28  }
  0x8e   :  { %299 = vst.msk [vmem:[%s702_s1 - $0x20] ss:$40 sm:$0xc] %vm7_vm0, %v53_v28   ;;  %v133_v30 = vpop.permute.xlu2 %132  }
  0x8f   :  { %297 = vst.msk [vmem:[%s702_s1 + $0x7] ss:$40 sm:$0xf] %vm7_vm0, %v47_v29  }
  0x90   :  { %318 = vst.msk [vmem:[%s702_s1 + $0x62] ss:$40 sm:$0x3] %vm7_vm0, %v133_v30  }
  0x91   :  { %319 = vst.msk [vmem:[%s702_s1 - $0x3e] ss:$40 sm:$0xc] %vm7_vm0, %v133_v30  }
  0x94   :  { %v77_v31 = vpop.permute.xlu1 %76  }
  0x95   :  { %v69_v32 = vpop.permute.xlu0 %68   ;;  %304 = vst.msk [vmem:[%s702_s1 + $0x83] ss:$-120 sm:$0x3] %vm7_vm0, %v77_v31  }
  0x96   :  { %305 = vst.msk [vmem:[%s702_s1 - $0x1d] ss:$40 sm:$0xc] %vm7_vm0, %v77_v31   ;;  %v157_v33 = vpop.permute.xlu2 %156  }
  0x97   :  { %302 = vst.msk [vmem:[%s702_s1 + $0x82] ss:$-120 sm:$0x3] %vm7_vm0, %v69_v32  }
  0x98   :  { %303 = vst.msk [vmem:[%s702_s1 - $0x1e] ss:$40 sm:$0xc] %vm7_vm0, %v69_v32  }
  0x99   :  { %324 = vst.msk [vmem:[%s702_s1 + $0x65] ss:$40 sm:$0x3] %vm7_vm0, %v157_v33  }
  0x9a   :  { %325 = vst.msk [vmem:[%s702_s1 - $0x3b] ss:$40 sm:$0xc] %vm7_vm0, %v157_v33  }
  0x9c   :  { %v101_v34 = vpop.permute.xlu1 %100  }
  0x9d   :  { %v93_v35 = vpop.permute.xlu0 %92   ;;  %310 = vst.msk [vmem:[%s702_s1 + $0x86] ss:$-120 sm:$0x3] %vm7_vm0, %v101_v34  }
  0x9e   :  { %311 = vst.msk [vmem:[%s702_s1 - $0x1a] ss:$40 sm:$0xc] %vm7_vm0, %v101_v34   ;;  %v181_v36 = vpop.permute.xlu2 %180  }
  0x9f   :  { %308 = vst.msk [vmem:[%s702_s1 + $0x85] ss:$-120 sm:$0x3] %vm7_vm0, %v93_v35  }
  0xa0   :  { %309 = vst.msk [vmem:[%s702_s1 - $0x1b] ss:$40 sm:$0xc] %vm7_vm0, %v93_v35  }
  0xa1   :  { %330 = vst.msk [vmem:[%s702_s1 + $0x40] ss:$40 sm:$0x7] %vm7_vm0, %v181_v36  }
  0xa2   :  { %331 = vst.msk [vmem:[%s702_s1 + $0x15] sm:$0x8] %vm7_vm0, %v181_v36  }
  0xa4   :  { %v125_v37 = vpop.permute.xlu1 %124  }
  0xa5   :  { %v117_v38 = vpop.permute.xlu0 %116   ;;  %316 = vst.msk [vmem:[%s702_s1 + $0x61] ss:$40 sm:$0x3] %vm7_vm0, %v125_v37  }
  0xa6   :  { %317 = vst.msk [vmem:[%s702_s1 - $0x3f] ss:$40 sm:$0xc] %vm7_vm0, %v125_v37   ;;  %v205_v39 = vpop.permute.xlu2 %204  }
  0xa7   :  { %314 = vst.msk [vmem:[%s702_s1 + $0x60] ss:$40 sm:$0x3] %vm7_vm0, %v117_v38  }
  0xa8   :  { %315 = vst.msk [vmem:[%s702_s1 - $0x40] ss:$40 sm:$0xc] %vm7_vm0, %v117_v38  }
  0xa9   :  { %336 = vst.msk [vmem:[%s702_s1 + $0x43] ss:$40 sm:$0x7] %vm7_vm0, %v205_v39  }
  0xaa   :  { %337 = vst.msk [vmem:[%s702_s1 + $0x18] sm:$0x8] %vm7_vm0, %v205_v39  }
  0xac   :  { %v149_v40 = vpop.permute.xlu1 %148  }
  0xad   :  { %v141_v41 = vpop.permute.xlu0 %140   ;;  %322 = vst.msk [vmem:[%s702_s1 + $0x64] ss:$40 sm:$0x3] %vm7_vm0, %v149_v40  }
  0xae   :  { %323 = vst.msk [vmem:[%s702_s1 - $0x3c] ss:$40 sm:$0xc] %vm7_vm0, %v149_v40   ;;  %v229_v42 = vpop.permute.xlu2 %228  }
  0xaf   :  { %320 = vst.msk [vmem:[%s702_s1 + $0x63] ss:$40 sm:$0x3] %vm7_vm0, %v141_v41  }
  0xb0   :  { %321 = vst.msk [vmem:[%s702_s1 - $0x3d] ss:$40 sm:$0xc] %vm7_vm0, %v141_v41  }
  0xb1   :  { %342 = vst.msk [vmem:[%s702_s1 + $0x46] ss:$40 sm:$0x7] %vm7_vm0, %v229_v42  }
  0xb2   :  { %343 = vst.msk [vmem:[%s702_s1 + $0x1b] sm:$0x8] %vm7_vm0, %v229_v42  }
  0xb4   :  { %v173_v43 = vpop.permute.xlu1 %172  }
  0xb5   :  { %v165_v44 = vpop.permute.xlu0 %164   ;;  %328 = vst.msk [vmem:[%s702_s1 + $0x67] ss:$40 sm:$0x3] %vm7_vm0, %v173_v43  }
  0xb6   :  { %329 = vst.msk [vmem:[%s702_s1 - $0x39] ss:$40 sm:$0xc] %vm7_vm0, %v173_v43   ;;  %v251_v45 = vpop.permute.xlu2 %250  }
  0xb7   :  { %326 = vst.msk [vmem:[%s702_s1 + $0x66] ss:$40 sm:$0x3] %vm7_vm0, %v165_v44  }
  0xb8   :  { %327 = vst.msk [vmem:[%s702_s1 - $0x3a] ss:$40 sm:$0xc] %vm7_vm0, %v165_v44  }
  0xb9   :  { %347 = vst.msk [vmem:[%s702_s1 + $0x21] ss:$40 sm:$0xf] %vm7_vm0, %v251_v45  }
  0xbc   :  { %v197_v46 = vpop.permute.xlu1 %196  }
  0xbd   :  { %v189_v47 = vpop.permute.xlu0 %188   ;;  %334 = vst.msk [vmem:[%s702_s1 + $0x42] ss:$40 sm:$0x7] %vm7_vm0, %v197_v46  }
  0xbe   :  { %335 = vst.msk [vmem:[%s702_s1 + $0x17] sm:$0x8] %vm7_vm0, %v197_v46   ;;  %v269_v48 = vpop.permute.xlu2 %268  }
  0xbf   :  { %332 = vst.msk [vmem:[%s702_s1 + $0x41] ss:$40 sm:$0x7] %vm7_vm0, %v189_v47  }
  0xc0   :  { %333 = vst.msk [vmem:[%s702_s1 + $0x16] sm:$0x8] %vm7_vm0, %v189_v47  }
  0xc1   :  { %350 = vst.msk [vmem:[%s702_s1 + $0x24] ss:$40 sm:$0xf] %vm7_vm0, %v269_v48  }
  0xc4   :  { %v221_v50 = vpop.permute.xlu1 %220  }
  0xc5   :  { %v213_v51 = vpop.permute.xlu0 %212   ;;  %340 = vst.msk [vmem:[%s702_s1 + $0x45] ss:$40 sm:$0x7] %vm7_vm0, %v221_v50  }
  0xc6   :  { %341 = vst.msk [vmem:[%s702_s1 + $0x1a] sm:$0x8] %vm7_vm0, %v221_v50   ;;  %v287_v52 = vpop.permute.xlu2 %286  }
  0xc7   :  { %338 = vst.msk [vmem:[%s702_s1 + $0x44] ss:$40 sm:$0x7] %vm7_vm0, %v213_v51  }
  0xc8   :  { %339 = vst.msk [vmem:[%s702_s1 + $0x19] sm:$0x8] %vm7_vm0, %v213_v51  }
  0xc9   :  { %353 = vst.msk [vmem:[%s702_s1 + $0x27] ss:$40 sm:$0xf] %vm7_vm0, %v287_v52  }
  0xcc   :  { %v245_v53 = vpop.permute.xlu1 %244  }
  0xcd   :  { %v237_v54 = vpop.permute.xlu0 %236   ;;  %346 = vst.msk [vmem:[%s702_s1 + $0x20] ss:$40 sm:$0xf] %vm7_vm0, %v245_v53  }
  0xce   :  { %344 = vst.msk [vmem:[%s702_s1 + $0x47] ss:$40 sm:$0x7] %vm7_vm0, %v237_v54  }
  0xcf   :  { %345 = vst.msk [vmem:[%s702_s1 + $0x1c] sm:$0x8] %vm7_vm0, %v237_v54  }
  0xd4   :  { %v263_v55 = vpop.permute.xlu1 %262  }
  0xd5   :  { %v257_v56 = vpop.permute.xlu0 %256   ;;  %349 = vst.msk [vmem:[%s702_s1 + $0x23] ss:$40 sm:$0xf] %vm7_vm0, %v263_v55  }
  0xd6   :  { %348 = vst.msk [vmem:[%s702_s1 + $0x22] ss:$40 sm:$0xf] %vm7_vm0, %v257_v56  }
  0xdc   :  { %v281_v57 = vpop.permute.xlu1 %280  }
  0xdd   :  { %v275_v58 = vpop.permute.xlu0 %274   ;;  %352 = vst.msk [vmem:[%s702_s1 + $0x26] ss:$40 sm:$0xf] %vm7_vm0, %v281_v57  }
  0xde   :  { %351 = vst.msk [vmem:[%s702_s1 + $0x25] ss:$40 sm:$0xf] %vm7_vm0, %v275_v58  }

// kernel: conv1d_forward.1
= control target key start
LH: loop header
LB: loop body
LE: loop exit
PB: predicated region body
PF: predicated region fallthrough
CT: control target
= control target key end

     0   :  { %s2165_s27 = smov 0   ;;  %s3390_s0 = inlined_call_operand.vmem [shape: f32[2,160,1], index: 0, kind: input, shape index: {}]   ;;  %s3391_s1 = inlined_call_operand.vmem [shape: f32[160,1], index: 1, kind: input, shape index: {}]   ;;  %s3392_s2 = inlined_call_operand.vmem [shape: f32[3,64], index: 2, kind: input, shape index: {}]   ;;  %s3393_s3 = inlined_call_operand.vmem [shape: f32[1,64], index: 3, kind: input, shape index: {}]   ;;  %s3394_s4 = inlined_call_operand.vmem [shape: f32[192,128], index: 4, kind: input, shape index: {}]   ;;  %s3395_s5 = inlined_call_operand.vmem [shape: f32[1,128], index: 5, kind: input, shape index: {}]   ;;  %s3396_s6 = inlined_call_operand.vmem [shape: f32[4,40,128], index: 6, kind: input, shape index: {}]   ;;  %s3397_s7 = inlined_call_operand.vmem [shape: f32[1,4], index: 7, kind: input, shape index: {}]   ;;  %s3398_s8 = inlined_call_operand.vmem [shape: f32[2,4,4], index: 8, kind: output, shape index: {}]  }
   0x1 LB: > { %s1988_s28 = sadd.s32 4294967295, %s2116_s27   ;;  %p1992_p0 = scmp.ge.s32.totalorder %s2116_s27, 1  ;;  %s2116_s27 = sphi %s2165_s27, %s18_s27  }
   0x2   : > { %p262_p1 = scmp.lt.s32.totalorder %s2116_s27, 3 }
   0x4   : > { %p263_p2 = pnand %p1992_p0, %p262_p1 }
   0x6   : > { %266 = sbr.rel (%p263_p2) target bundleno = 916 (0x394), region = 52 }
   0xb   : > { %p295_p3 = scmp.lt.s32.totalorder %s1988_s28, 1  ;;  %v3399_v0 = vmov 0   ;;  %vm446_vm0 = vcmask 1046528   ;;  %vm610_vm1 = vcmask 1045504   ;;  %s2119_s11 = smov 64   ;;  %vm1221_vm2 = vcmask 523264  }
   0xc   : > { %2054 = vset.pattern.permute.xlu2 %v3399_v0  ;;  %2053 = vset.pattern.permute.xlu1 %v3399_v0  ;;  %vm1861_vm3 = vcmask 1041409   ;;  %vm1863_vm4 = vcmask 1042434   ;;  %vm1865_vm5 = vcmask 1043459   ;;  %vm1880_vm6 = vcmask 1043456  }
   0xd   : > { %2052 = vset.pattern.permute.xlu0 %v3399_v0  ;;  %s3410_s28 = smov (!%p295_p3, %s1988_s28), 1  ;;  %vm1933_vm7 = vcmask 27648  }
   0xe   : > { %s2041_s29 = smul.u32 160, %s3410_s28  ;;  %s1994_s30 = sshll.u32 %s3410_s28, 2 }
   0xf   : > { %s303_s12 = scalar_lea.vmem %s3398_s8, %s1994_s30 }
  0x10   : > { %s2182_s10 = scalar_lea.vmem %s3390_s0, %s2041_s29 }
  0x11   : > { %v2185_v1 = vld [vmem:[%s2182_s10 + $0x20] sm:$0xff]  ;;  %v2188_v2 = vld [vmem:[%s2182_s10 + $0x10] sm:$0xff]  ;;  %v2197_v4 = vld [vmem:[%s2182_s10 + $0x28] sm:$0xff] }
  0x12   : > { %v2191_v3 = vld [vmem:[%s2182_s10] sm:$0xff]  ;;  %347 = vperm.xlu2 %2054, %v2185_v1   ;;  %337 = vperm.xlu1 %2053, %v2188_v2   ;;  %v2200_v5 = vld [vmem:[%s2182_s10 + $0x18] sm:$0xff]  ;;  %v2203_v6 = vld [vmem:[%s2182_s10 + $0x8] sm:$0xff]  ;;  %v454_v24 = vrot.slane %v2185_v1, 1  ;;  %v450_v25 = vrot.slane %v2188_v2, 1  ;;  %v456_v30 = vrot.slane %v2197_v4, 1 }
  0x13   : > { %327 = vperm.xlu0 %2052, %v2191_v3   ;;  %v2209_v7 = vld [vmem:[%s2182_s10 + $0x40] sm:$0xff]  ;;  %v2212_v8 = vld [vmem:[%s2182_s10 + $0x38] sm:$0xff]  ;;  %v2215_v9 = vld [vmem:[%s2182_s10 + $0x30] sm:$0xff]  ;;  %v447_v19 = vrot.slane %v2191_v3, 1  ;;  %v448_v20 = vrot.slane %v2203_v6, 1  ;;  %v452_v26 = vrot.slane %v2200_v5, 1 }
  0x14   : > { %v2221_v10 = vld [vmem:[%s2182_s10 + $0x58] sm:$0xff]  ;;  %v2224_v11 = vld [vmem:[%s2182_s10 + $0x50] sm:$0xff]  ;;  %v2227_v12 = vld [vmem:[%s2182_s10 + $0x48] sm:$0xff]  ;;  %v460_v31 = vrot.slane %v2212_v8, 1  ;;  %v458_v32 = vrot.slane %v2215_v9, 1  ;;  %v457_v35 = vsel %vm446_vm0, %v454_v24, %v456_v30  ;;  %v462_v36 = vrot.slane %v2209_v7, 1 }
  0x15   : > { %v2233_v13 = vld [vmem:[%s2182_s10 + $0x70] sm:$0xff]  ;;  %v2236_v14 = vld [vmem:[%s2182_s10 + $0x68] sm:$0xff]  ;;  %v2239_v15 = vld [vmem:[%s2182_s10 + $0x60] sm:$0xff]  ;;  %v449_v22 = vsel %vm446_vm0, %v447_v19, %v448_v20  ;;  %v453_v27 = vsel %vm446_vm0, %v450_v25, %v452_v26  ;;  %v455_v28 = vsel %vm446_vm0, %v452_v26, %v454_v24  ;;  %v451_v29 = vsel %vm446_vm0, %v448_v20, %v450_v25 }
  0x16   : > { %v2245_v16 = vld [vmem:[%s2182_s10 + $0x88] sm:$0xff]  ;;  %v2248_v17 = vld [vmem:[%s2182_s10 + $0x80] sm:$0xff]  ;;  %v2251_v18 = vld [vmem:[%s2182_s10 + $0x78] sm:$0xff]  ;;  %v459_v33 = vsel %vm446_vm0, %v456_v30, %v458_v32  ;;  %v461_v34 = vsel %vm446_vm0, %v458_v32, %v460_v31  ;;  %v466_v37 = vrot.slane %v2224_v11, 1  ;;  %v464_v38 = vrot.slane %v2227_v12, 1 }
  0x17   : > { %v2259_v21 = vld [vmem:[%s2182_s10 + $0x98] sm:$0xff]  ;;  %v2263_v23 = vld [vmem:[%s2182_s10 + $0x90] sm:$0xff]  ;;  %v611_v39 = vrot.slane %v2191_v3, 2  ;;  %v612_v40 = vrot.slane %v2203_v6, 2  ;;  %v463_v43 = vsel %vm446_vm0, %v460_v31, %v462_v36  ;;  %v614_v44 = vrot.slane %v2188_v2, 2 }
  0x18   : > { %v465_v41 = vsel %vm446_vm0, %v462_v36, %v464_v38  ;;  %v467_v42 = vsel %vm446_vm0, %v464_v38, %v466_v37  ;;  %v616_v45 = vrot.slane %v2200_v5, 2  ;;  %v468_v47 = vrot.slane %v2221_v10, 1  ;;  %v928_v20 = vld [vmem:[%s3391_s1 + $0x50] sm:$0xff]  ;;  %v929_v31 = vld [vmem:[%s3391_s1 + $0x58] sm:$0xff] }
  0x19   : > { %v613_v46 = vsel %vm610_vm1, %v611_v39, %v612_v40  ;;  %v630_v48 = vrot.slane %v2224_v11, 2  ;;  %v628_v49 = vrot.slane %v2227_v12, 2  ;;  %v470_v50 = vrot.slane %v2239_v15, 1 }
  0x1a   : > { %352 = vperm.xlu2 %2054, %v2197_v4   ;;  %342 = vperm.xlu1 %2053, %v2200_v5   ;;  %v617_v51 = vsel %vm610_vm1, %v614_v44, %v616_v45  ;;  %v469_v54 = vsel %vm446_vm0, %v466_v37, %v468_v47  ;;  %v640_v55 = vrot.slane %v2251_v18, 2  ;;  %v615_v56 = vsel %vm610_vm1, %v612_v40, %v614_v44 }
  0x1b   : > { %332 = vperm.xlu0 %2052, %v2203_v6   ;;  %v471_v52 = vsel %vm446_vm0, %v468_v47, %v470_v50  ;;  %v631_v53 = vsel %vm610_vm1, %v628_v49, %v630_v48  ;;  %v632_v57 = vrot.slane %v2221_v10, 2  ;;  %v472_v58 = vrot.slane %v2236_v14, 1 }
  0x1c   : > { %v634_v59 = vrot.slane %v2239_v15, 2  ;;  %v638_v60 = vrot.slane %v2233_v13, 2  ;;  %v618_v61 = vrot.slane %v2185_v1, 2  ;;  %v476_v62 = vrot.slane %v2251_v18, 1 }
  0x1d   : > { %v473_v3 = vsel %vm446_vm0, %v470_v50, %v472_v58  ;;  %v474_v5 = vrot.slane %v2233_v13, 1  ;;  %v633_v6 = vsel %vm610_vm1, %v630_v48, %v632_v57  ;;  %v642_v24 = vrot.slane %v2248_v17, 2  ;;  %v2372_v50 = vld [vmem:[%s3392_s2] sm:$0x7] }
  0x1e   : > { %v641_v63 = vsel %vm610_vm1, %v638_v60, %v640_v55  ;;  %v635_v2 = vsel %vm610_vm1, %v632_v57, %v634_v59  ;;  %v619_v1 = vsel %vm610_vm1, %v616_v45, %v618_v61  ;;  %v620_v25 = vrot.slane %v2197_v4, 2 }
  0x1f   : > { %v643_v26 = vsel %vm610_vm1, %v640_v55, %v642_v24  ;;  %v480_v30 = vrot.slane %v2245_v16, 1  ;;  %v622_v32 = vrot.slane %v2215_v9, 2  ;;  %v644_v36 = vrot.slane %v2245_v16, 2 }
  0x20   : > { %v624_v48 = vrot.slane %v2212_v8, 2 }
  0x21   : > { %v623_v37 = vsel %vm610_vm1, %v620_v25, %v622_v32  ;;  %v645_v38 = vsel %vm610_vm1, %v642_v24, %v644_v36 }
  0x22   : > { %367 = vperm.xlu2 %2054, %v2209_v7   ;;  %362 = vperm.xlu1 %2053, %v2212_v8  }
  0x23   : > { %357 = vperm.xlu0 %2052, %v2215_v9   ;;  %v482_v9 = vrot.slane %v2263_v23, 1 }
  0x25   : > { %v483_v44 = vsel %vm446_vm0, %v480_v30, %v482_v9 }
  0x2a   : > { %382 = vperm.xlu2 %2054, %v2221_v10   ;;  %377 = vperm.xlu1 %2053, %v2224_v11   ;;  %v478_v10 = vrot.slane %v2248_v17, 1  ;;  %v477_v11 = vsel %vm446_vm0, %v474_v5, %v476_v62 }
  0x2b   : > { %372 = vperm.xlu0 %2052, %v2227_v12  }
  0x2c   : > { %v479_v19 = vsel %vm446_vm0, %v476_v62, %v478_v10  ;;  %v481_v4 = vsel %vm446_vm0, %v478_v10, %v480_v30  ;;  %v931_v62 = vld [vmem:[%s3391_s1 + $0x68] sm:$0xff] }
  0x32   : > { %397 = vperm.xlu2 %2054, %v2233_v13   ;;  %392 = vperm.xlu1 %2053, %v2236_v14   ;;  %v927_v13 = vld [vmem:[%s3391_s1 + $0x48] sm:$0xff] }
  0x33   : > { %387 = vperm.xlu0 %2052, %v2239_v15   ;;  %v636_v15 = vrot.slane %v2236_v14, 2 }
  0x3a   : > { %412 = vperm.xlu2 %2054, %v2245_v16   ;;  %407 = vperm.xlu1 %2053, %v2248_v17   ;;  %v918_v16 = vld [vmem:[%s3391_s1] sm:$0xff] }
  0x3b   : > { %402 = vperm.xlu0 %2052, %v2251_v18  }
  0x42   : > { %422 = vperm.xlu1 %2053, %v2259_v21   ;;  %489 = vperm.xlu2 %2054, %v449_v22   ;;  %v637_v22 = vsel %vm610_vm1, %v634_v59, %v636_v15 }
  0x43   : > { %417 = vperm.xlu0 %2052, %v2263_v23  }
  0x4a   : > { %497 = vperm.xlu1 %2053, %v453_v27   ;;  %501 = vperm.xlu2 %2054, %v455_v28   ;;  %v639_v27 = vsel %vm610_vm1, %v636_v15, %v638_v60  ;;  %v475_v28 = vsel %vm446_vm0, %v472_v58, %v474_v5  ;;  %v932_v15 = vld [vmem:[%s3391_s1 + $0x70] sm:$0xff] }
  0x4b   : > { %493 = vperm.xlu0 %2052, %v451_v29   ;;  %v621_v29 = vsel %vm610_vm1, %v618_v61, %v620_v25  ;;  %v920_v61 = vld [vmem:[%s3391_s1 + $0x10] sm:$0xff] }
  0x52   : > { %509 = vperm.xlu1 %2053, %v459_v33   ;;  %513 = vperm.xlu2 %2054, %v461_v34  }
  0x53   : > { %505 = vperm.xlu0 %2052, %v457_v35  }
  0x5a   : > { %521 = vperm.xlu1 %2053, %v465_v41   ;;  %525 = vperm.xlu2 %2054, %v467_v42   ;;  %v646_v42 = vrot.slane %v2263_v23, 2 }
  0x5b   : > { %517 = vperm.xlu0 %2052, %v463_v43   ;;  %v930_v43 = vld [vmem:[%s3391_s1 + $0x60] sm:$0xff] }
  0x5c   : > { %v647_v45 = vsel %vm610_vm1, %v644_v36, %v646_v42 }
  0x62   : > { %533 = vperm.xlu1 %2053, %v471_v52   ;;  %689 = vperm.xlu2 %2054, %v631_v53   ;;  %v2378_v52 = vperm.slane %v2372_v50, 1  ;;  %v625_v53 = vsel %vm610_vm1, %v622_v32, %v624_v48 }
  0x63   : > { %529 = vperm.xlu0 %2052, %v469_v54   ;;  %v2382_v54 = vperm.slane %v2372_v50, 0 }
  0x6a   : > { %697 = vperm.xlu1 %2053, %v635_v2   ;;  %537 = vperm.xlu2 %2054, %v473_v3  }
  0x6b   : > { %693 = vperm.xlu0 %2052, %v633_v6  }
  0x6c   : > { %v2317_v18 = vpop.permute.xlu2 %347 }
  0x72   : > { %985 = vperm.xlu1 %2053, %v927_v13   ;;  %990 = vperm.xlu2 %2054, %v928_v20  }
  0x73   : > { %701 = vperm.xlu0 %2052, %v637_v22  }
  0x74   : > { %v2328_v14 = vpop.permute.xlu2 %352 }
  0x7a   : > { %705 = vperm.xlu1 %2053, %v639_v27   ;;  %653 = vperm.xlu2 %2054, %v613_v46   ;;  %v921_v27 = vld [vmem:[%s3391_s1 + $0x18] sm:$0xff] }
  0x7b   : > { %541 = vperm.xlu0 %2052, %v475_v28   ;;  %v484_v28 = vrot.slane %v2259_v21, 1 }
  0x7c   : > { %v2336_v17 = vpop.permute.xlu2 %367 }
  0x7d   : > { %v485_v32 = vsel %vm446_vm0, %v482_v9, %v484_v28  ;;  %v922_v9 = vld [vmem:[%s3391_s1 + $0x20] sm:$0xff] }
  0x82   : > { %661 = vperm.xlu1 %2053, %v617_v51   ;;  %995 = vperm.xlu2 %2054, %v929_v31   ;;  %v919_v51 = vld [vmem:[%s3391_s1 + $0x8] sm:$0xff] }
  0x83   : > { %657 = vperm.xlu0 %2052, %v615_v56   ;;  %v648_v56 = vrot.slane %v2259_v21, 2 }
  0x84   : > { %v2343_v33 = vpop.permute.xlu2 %382  ;;  %v2345_v34 = vpop.permute.xlu1 %337 }
  0x85   : > { %v328_v35 = vpop.permute.xlu0 %327 }
  0x86   : > { %v426_v57 = vmul.f32 %v2382_v54, %v328_v35 }
  0x8a   : > { %709 = vperm.xlu1 %2053, %v641_v63   ;;  %665 = vperm.xlu2 %2054, %v619_v1   ;;  %v649_v63 = vsel %vm610_vm1, %v646_v42, %v648_v56 }
  0x8b   : > { %545 = vperm.xlu0 %2052, %v477_v11   ;;  %v626_v11 = vrot.slane %v2209_v7, 2 }
  0x8c   : > { %v2350_v39 = vpop.permute.xlu2 %397  ;;  %v343_v40 = vpop.permute.xlu1 %342 }
  0x8d   : > { %v2352_v41 = vpop.permute.xlu0 %332  ;;  %v429_v5 = vmul.f32 %v2382_v54, %v343_v40 }
  0x8e   : > { %v427_v42 = vmul.f32 %v2382_v54, %v2352_v41 }
  0x92   : > { %549 = vperm.xlu1 %2053, %v479_v19   ;;  %940 = vperm.xlu2 %2054, %v918_v16   ;;  %v627_v19 = vsel %vm610_vm1, %v624_v48, %v626_v11 }
  0x93   : > { %1000 = vperm.xlu0 %2052, %v930_v43  }
  0x94   : > { %v2364_v46 = vpop.permute.xlu2 %412  ;;  %v2366_v47 = vpop.permute.xlu1 %362 }
  0x95   : > { %v358_v23 = vpop.permute.xlu0 %357 }
  0x96   : > { %v432_v22 = vmul.f32 %v2382_v54, %v358_v23  ;;  %v431_v23 = vmul.f32 %v2382_v54, %v2328_v14 }
  0x9a   : > { %713 = vperm.xlu1 %2053, %v643_v26   ;;  %669 = vperm.xlu2 %2054, %v621_v29  }
  0x9b   : > { %945 = vperm.xlu0 %2052, %v919_v51   ;;  %v430_v51 = vmul.f32 %v2382_v54, %v2317_v18 }
  0x9c   : > { %v2384_v8 = vpop.permute.xlu1 %377  ;;  %v490_v55 = vpop.permute.xlu2 %489 }
  0x9d   : > { %v2388_v58 = vpop.permute.xlu0 %372  ;;  %v570_v59 = vmul.f32 %v2378_v52, %v490_v55 }
  0x9f   : > { %v2391_v60 = vadd.f32 %v570_v59, %v426_v57  ;;  %v934_v57 = vld [vmem:[%s3391_s1 + $0x80] sm:$0xff] }
  0xa2   : > { %553 = vperm.xlu1 %2053, %v481_v4   ;;  %950 = vperm.xlu2 %2054, %v920_v61   ;;  %v933_v4 = vld [vmem:[%s3391_s1 + $0x78] sm:$0xff] }
  0xa3   : > { %1005 = vperm.xlu0 %2052, %v931_v62   ;;  %v434_v62 = vmul.f32 %v2382_v54, %v2336_v17  ;;  %v923_v17 = vld [vmem:[%s3391_s1 + $0x28] sm:$0xff] }
  0xa4   : > { %v2402_v2 = vpop.permute.xlu1 %392  ;;  %v502_v3 = vpop.permute.xlu2 %501 }
  0xa5   : > { %v2405_v6 = vpop.permute.xlu0 %387  ;;  %v573_v10 = vmul.f32 %v2378_v52, %v502_v3  ;;  %v433_v3 = vmul.f32 %v2382_v54, %v2366_v47 }
  0xa7   : > { %v2409_v1 = vadd.f32 %v573_v10, %v429_v5 }
  0xaa   : > { %673 = vperm.xlu1 %2053, %v623_v37   ;;  %1010 = vperm.xlu2 %2054, %v932_v15   ;;  %v428_v37 = vmul.f32 %v2382_v54, %v2345_v34  ;;  %v651_v15 = vsel %vm610_vm1, %v648_v56, 0.0  ;;  %v435_v56 = vmul.f32 %v2382_v54, %v2388_v58 }
  0xab   : > { %717 = vperm.xlu0 %2052, %v645_v38  }
  0xac   : > { %v2417_v13 = vpop.permute.xlu1 %407  ;;  %v514_v20 = vpop.permute.xlu2 %513 }
  0xad   : > { %v2420_v24 = vpop.permute.xlu0 %402  ;;  %v576_v25 = vmul.f32 %v2378_v52, %v514_v20  ;;  %v2486_v20 = vperm.slane %v2372_v50, 2  ;;  %v935_v50 = vld [vmem:[%s3391_s1 + $0x88] sm:$0xff] }
  0xae   : > { %v441_v7 = vmul.f32 %v2382_v54, %v2420_v24 }
  0xaf   : > { %v2423_v26 = vadd.f32 %v576_v25, %v432_v22 }
  0xb2   : > { %955 = vperm.xlu1 %2053, %v921_v27   ;;  %721 = vperm.xlu2 %2054, %v647_v45  }
  0xb3   : > { %557 = vperm.xlu0 %2052, %v483_v44  }
  0xb4   : > { %v2429_v29 = vpop.permute.xlu1 %422  ;;  %v526_v30 = vpop.permute.xlu2 %525 }
  0xb5   : > { %v2431_v31 = vpop.permute.xlu0 %417  ;;  %v579_v47 = vmul.f32 %v2378_v52, %v526_v30 }
  0xba   : > { %1015 = vperm.xlu1 %2053, %v933_v4   ;;  %561 = vperm.xlu2 %2054, %v485_v32   ;;  %v924_v32 = vld [vmem:[%s3391_s1 + $0x30] sm:$0xff] }
  0xbb   : > { %677 = vperm.xlu0 %2052, %v625_v53  }
  0xbc   : > { %v498_v35 = vpop.permute.xlu1 %497  ;;  %v690_v36 = vpop.permute.xlu2 %689 }
  0xbd   : > { %v572_v38 = vmul.f32 %v2378_v52, %v498_v35  ;;  %v494_v40 = vpop.permute.xlu0 %493  ;;  %v743_v4 = vmul.f32 %v2486_v20, %v690_v36  ;;  %v599_v35 = vadd.f32 %v579_v47, %v435_v56  ;;  %v437_v36 = vmul.f32 %v2382_v54, %v2343_v33 }
  0xbe   : > { %v571_v16 = vmul.f32 %v2378_v52, %v494_v40  ;;  %v436_v40 = vmul.f32 %v2382_v54, %v2384_v8  ;;  %v1264_v8 = vld [vmem:[%s3394_s4 + $0xb0] sm:$0xff] }
  0xbf   : > { %v2445_v43 = vadd.f32 %v572_v38, %v428_v37  ;;  %v2504_v37 = vld [vmem:[%s3393_s3] ss:$0 sm:$0xff]  ;;  %v763_v38 = vadd.f32 %v743_v4, %v599_v35 }
  0xc0   : > { %v2447_v44 = vadd.f32 %v571_v16, %v427_v42 }
  0xc2   : > { %725 = vperm.xlu1 %2053, %v649_v63  }
  0xc3   : > { %960 = vperm.xlu0 %2052, %v922_v9   ;;  %v1265_v9 = vld [vmem:[%s3394_s4 + $0xb8] sm:$0xff] }
  0xc4   : > { %v510_v45 = vpop.permute.xlu1 %509  ;;  %v2452_v34 = vpop.permute.xlu2 %537  ;;  %2033 = vmatpush.msra.mxu3 %v1265_v9  ;;  %1396 = vmatpush.msra.mxu1 %v1265_v9 }
  0xc5   : > { %v575_v41 = vmul.f32 %v2378_v52, %v510_v45  ;;  %v506_v48 = vpop.permute.xlu0 %505 }
  0xc6   : > { %v574_v53 = vmul.f32 %v2378_v52, %v506_v48  ;;  %v787_v48 = vadd.f32 %v2504_v37, %v763_v38  ;;  %2034 = vmatpush.msra.mxu3 %v1264_v8  ;;  %1397 = vmatpush.msra.mxu1 %v1264_v8 }
  0xc7   : > { %v2460_v55 = vadd.f32 %v575_v41, %v431_v23 }
  0xc8   : > { %v2465_v59 = vadd.f32 %v574_v53, %v430_v51 }
  0xca   : > { %1020 = vperm.xlu1 %2053, %v934_v57   ;;  %v925_v57 = vld [vmem:[%s3391_s1 + $0x38] sm:$0xff] }
  0xcb   : > { %681 = vperm.xlu0 %2052, %v627_v19  }
  0xcc   : > { %v522_v61 = vpop.permute.xlu1 %521  ;;  %v2467_v14 = vpop.permute.xlu2 %990 }
  0xcd   : > { %v578_v18 = vmul.f32 %v2378_v52, %v522_v61  ;;  %v518_v63 = vpop.permute.xlu0 %517 }
  0xce   : > { %v577_v5 = vmul.f32 %v2378_v52, %v518_v63 }
  0xcf   : > { %v2475_v10 = vadd.f32 %v578_v18, %v434_v62  ;;  %v936_v62 = vld [vmem:[%s3391_s1 + $0x90] sm:$0xff]  ;;  %v1263_v18 = vld [vmem:[%s3394_s4 + $0xa8] sm:$0xff] }
  0xd0   : > { %v2480_v19 = vadd.f32 %v577_v5, %v433_v3  ;;  %2035 = vmatpush.msra.mxu3 %v1263_v18  ;;  %1398 = vmatpush.msra.mxu1 %v1263_v18  ;;  %v582_v3 = vmul.f32 %v2378_v52, %v2452_v34  ;;  %v1261_v34 = vld [vmem:[%s3394_s4 + $0x98] sm:$0xff]  ;;  %v439_v18 = vmul.f32 %v2382_v54, %v2402_v2 }
  0xd2   : > { %730 = vperm.xlu1 %2053, %v651_v15   ;;  %v807_v15 = vmax.f32 %v787_v48, 0.0 }
  0xd3   : > { %965 = vperm.xlu0 %2052, %v923_v17   ;;  %v1262_v17 = vld [vmem:[%s3394_s4 + $0xa0] sm:$0xff] }
  0xd4   : > { %v534_v22 = vpop.permute.xlu1 %533  ;;  %v2489_v25 = vpop.permute.xlu2 %653  ;;  %2036 = vmatpush.msra.mxu3 %v1262_v17  ;;  %1399 = vmatpush.msra.mxu1 %v1262_v17  ;;  %v2543_v38 = vrot.slane %v807_v15, 1 }
  0xd5   : > { %v530_v27 = vpop.permute.xlu0 %529  ;;  %v581_v30 = vmul.f32 %v2378_v52, %v534_v22  ;;  %v438_v22 = vmul.f32 %v2382_v54, %v2405_v6  ;;  %v1260_v6 = vld [vmem:[%s3394_s4 + $0x90] sm:$0xff] }
  0xd6   : > { %v580_v58 = vmul.f32 %v2378_v52, %v530_v27  ;;  %2037 = vmatpush.msra.mxu3 %v1261_v34  ;;  %1400 = vmatpush.msra.mxu1 %v1261_v34 }
  0xd7   : > { %v601_v45 = vadd.f32 %v581_v30, %v437_v36  ;;  %v926_v36 = vld [vmem:[%s3391_s1 + $0x40] sm:$0xff] }
  0xd8   : > { %v600_v33 = vadd.f32 %v580_v58, %v436_v40  ;;  %2038 = vmatpush.msra.mxu3 %v1260_v6  ;;  %1401 = vmatpush.msra.mxu1 %v1260_v6 }
  0xda   : > { %970 = vperm.xlu1 %2053, %v924_v32  }
  0xdb   : > { %1025 = vperm.xlu0 %2052, %v935_v50   ;;  %v602_v50 = vadd.f32 %v582_v3, %v438_v22 }
  0xdc   : > { %v698_v42 = vpop.permute.xlu1 %697  ;;  %v2511_v16 = vpop.permute.xlu2 %995 }
  0xdd   : > { %v745_v23 = vmul.f32 %v2486_v20, %v698_v42  ;;  %v694_v41 = vpop.permute.xlu0 %693 }
  0xde   : > { %v744_v51 = vmul.f32 %v2486_v20, %v694_v41  ;;  %v1258_v41 = vld [vmem:[%s3394_s4 + $0x80] sm:$0xff] }
  0xdf   : > { %v765_v53 = vadd.f32 %v745_v23, %v601_v45  ;;  %v937_v45 = vld [vmem:[%s3391_s1 + $0x98] sm:$0xff]  ;;  %v1259_v23 = vld [vmem:[%s3394_s4 + $0x88] sm:$0xff] }
  0xe0   : > { %v764_v61 = vadd.f32 %v744_v51, %v600_v33  ;;  %2039 = vmatpush.msra.mxu3 %v1259_v23  ;;  %1402 = vmatpush.msra.mxu1 %v1259_v23 }
  0xe1   : > { %v789_v63 = vadd.f32 %v2504_v37, %v765_v53 }
  0xe2   : > { %v788_v5 = vadd.f32 %v2504_v37, %v764_v61  ;;  %975 = vperm.xlu1 %2053, %v925_v57   ;;  %2040 = vmatpush.msra.mxu3 %v1258_v41 }
  0xe3   : > { %v809_v47 = vmax.f32 %v789_v63, 0.0  ;;  %1030 = vperm.xlu0 %2052, %v936_v62   ;;  %1403 = vmatpush.msra.mxu1 %v1258_v41  ;;  %v734_v63 = vmul.f32 %v2486_v20, %v2489_v25 }
  0xe4   : > { %v808_v27 = vmax.f32 %v788_v5, 0.0  ;;  %v986_v56 = vpop.permute.xlu1 %985  ;;  %v666_v4 = vpop.permute.xlu2 %665 }
  0xe5   : > { %v859_v32 = vrot.slane %v809_v47, 1  ;;  %v702_v35 = vpop.permute.xlu0 %701  ;;  %v737_v53 = vmul.f32 %v2486_v20, %v666_v4  ;;  %v754_v25 = vadd.f32 %v734_v63, %v2391_v60 }
  0xe6   : > { %v857_v30 = vrot.slane %v808_v27, 1  ;;  %v746_v58 = vmul.f32 %v2486_v20, %v702_v35 }
  0xe8   : > { %v860_v40 = vsel %vm446_vm0, %v857_v30, %v859_v32  ;;  %v858_v42 = vsel %vm446_vm0, %v2543_v38, %v857_v30  ;;  %v766_v9 = vadd.f32 %v746_v58, %v602_v50 }
  0xe9   : > { %v908_v48 = vmax.f32 %v808_v27, %v860_v40  ;;  %v907_v33 = vmax.f32 %v807_v15, %v858_v42  ;;  %v757_v27 = vadd.f32 %v737_v53, %v2409_v1  ;;  %v778_v40 = vadd.f32 %v2504_v37, %v754_v25 }
  0xea   : > { %v2565_v51 = vadd.f32 %v2504_v37, %v766_v9  ;;  %980 = vperm.xlu1 %2053, %v926_v36   ;;  %v440_v25 = vmul.f32 %v2382_v54, %v2350_v39 }
  0xeb   : > { %1035 = vperm.xlu0 %2052, %v937_v45   ;;  %v2579_v15 = vmul.f32 %v2467_v14, %v908_v48  ;;  %v2581_v17 = vmul.f32 %v986_v56, %v907_v33  ;;  %v781_v56 = vadd.f32 %v2504_v37, %v757_v27 }
  0xec   : > { %v810_v8 = vmax.f32 %v2565_v51, 0.0  ;;  %v706_v57 = vpop.permute.xlu1 %705  ;;  %v2569_v61 = vpop.permute.xlu2 %940 }
  0xed   : > { %v542_v62 = vpop.permute.xlu0 %541  ;;  %v747_v4 = vmul.f32 %v2486_v20, %v706_v57  ;;  %v1095_v50 = vrot.slane %v2581_v17, 1  ;;  %v1097_v14 = vrot.slane %v2579_v15, 1  ;;  %v801_v33 = vmax.f32 %v781_v56, 0.0 }
  0xee   : > { %v861_v3 = vrot.slane %v810_v8, 1  ;;  %v583_v5 = vmul.f32 %v2378_v52, %v542_v62 }
  0xef   : > { %v1098_v45 = vsel %vm446_vm0, %v1095_v50, %v1097_v14 }
  0xf0   : > { %v862_v22 = vsel %vm446_vm0, %v859_v32, %v861_v3  ;;  %v603_v2 = vadd.f32 %v583_v5, %v439_v18 }
  0xf1   : > { %v909_v34 = vmax.f32 %v809_v47, %v862_v22  ;;  %v843_v22 = vrot.slane %v801_v33, 1 }
  0xf2   : > { %v767_v35 = vadd.f32 %v747_v4, %v603_v2 }
  0xf3   : > { %v2589_v30 = vmul.f32 %v2511_v16, %v909_v34 }
  0xf4   : > { %v662_v58 = vpop.permute.xlu1 %661  ;;  %v670_v32 = vpop.permute.xlu2 %669  ;;  %v2594_v1 = vadd.f32 %v2504_v37, %v767_v35 }
  0xf5   : > { %v736_v6 = vmul.f32 %v2486_v20, %v662_v58  ;;  %v658_v47 = vpop.permute.xlu0 %657  ;;  %v738_v60 = vmul.f32 %v2486_v20, %v670_v32  ;;  %v1099_v36 = vrot.slane %v2589_v30, 1 }
  0xf6   : > { %v735_v16 = vmul.f32 %v2486_v20, %v658_v47  ;;  %v811_v53 = vmax.f32 %v2594_v1, 0.0  ;;  %v487_v1 = vsel %vm446_vm0, %v484_v28, 0.0 }
  0xf7   : > { %v756_v42 = vadd.f32 %v736_v6, %v2445_v43  ;;  %v758_v9 = vadd.f32 %v738_v60, %v2465_v59  ;;  %v1100_v23 = vsel %vm446_vm0, %v1097_v14, %v1099_v36  ;;  %v798_v59 = vmax.f32 %v778_v40, 0.0 }
  0xf8   : > { %v755_v41 = vadd.f32 %v735_v16, %v2447_v44  ;;  %v2055_v48 = vpack.i.bf16 %v1100_v23, %v1098_v45  ;;  %v863_v34 = vrot.slane %v811_v53, 1 }
  0xf9   : > { %v780_v57 = vadd.f32 %v2504_v37, %v756_v42  ;;  %v2613_v43 = vadd.f32 %v2504_v37, %v758_v9  ;;  %v838_v35 = vrot.slane %v798_v59, 1 }
  0xfa   : > { %v779_v62 = vadd.f32 %v2504_v37, %v755_v41  ;;  %2056 = vrot.lane.b32.xlu2 %v2055_v48, %s2119_s11  ;;  %v864_v16 = vsel %vm446_vm0, %v861_v3, %v863_v34  ;;  %v629_v3 = vsel %vm610_vm1, %v626_v11, %v628_v49 }
  0xfb   : > { %v802_v18 = vmax.f32 %v2613_v43, 0.0  ;;  %v800_v63 = vmax.f32 %v780_v57, 0.0  ;;  %v910_v41 = vmax.f32 %v810_v8, %v864_v16 }
  0xfc   : > { %v710_v5 = vpop.permute.xlu1 %709  ;;  %v799_v44 = vmax.f32 %v779_v62, 0.0 }
  0xfd   : > { %v2620_v27 = vrot.slane %v802_v18, 1  ;;  %v546_v4 = vpop.permute.xlu0 %545  ;;  %v841_v2 = vrot.slane %v800_v63, 1  ;;  %v748_v58 = vmul.f32 %v2486_v20, %v710_v5 }
  0xfe   : > { %v584_v14 = vmul.f32 %v2378_v52, %v546_v4  ;;  %v839_v56 = vrot.slane %v799_v44, 1 }
  0xff   : > { %v844_v32 = vsel %vm446_vm0, %v841_v2, %v843_v22  ;;  %v846_v6 = vsel %vm446_vm0, %v843_v22, %v2620_v27 }
 0x100   : > { %v604_v47 = vadd.f32 %v584_v14, %v440_v25  ;;  %v900_v60 = vmax.f32 %v800_v63, %v844_v32  ;;  %v842_v40 = vsel %vm446_vm0, %v839_v56, %v841_v2  ;;  %v840_v39 = vsel %vm446_vm0, %v838_v35, %v839_v56  ;;  %v951_v35 = vpop.permute.xlu2 %950 }
 0x101   : > { %v899_v42 = vmax.f32 %v799_v44, %v842_v40  ;;  %v898_v9 = vmax.f32 %v798_v59, %v840_v39  ;;  %v2635_v45 = vmax.f32 %v801_v33, %v846_v6  ;;  %v1140_v59 = vrot.slane %v2589_v30, 2 }
 0x102   : > { %v768_v23 = vadd.f32 %v748_v58, %v604_v47  ;;  %566 = vperm.xlu2 %2054, %v487_v1   ;;  %v2676_v6 = vmul.f32 %v951_v35, %v900_v60 }
 0x103   : > { %v2658_v11 = vmul.f32 %v2569_v61, %v898_v9 }
 0x104   : > { %v792_v21 = vadd.f32 %v2504_v37, %v768_v23  ;;  %v550_v28 = vpop.permute.xlu1 %549  ;;  %v1081_v23 = vrot.slane %v2676_v6, 1 }
 0x105   : > { %v1001_v48 = vpop.permute.xlu0 %1000  ;;  %v585_v5 = vmul.f32 %v2378_v52, %v550_v28  ;;  %v1078_v56 = vrot.slane %v2658_v11, 1 }
 0x106   : > { %v812_v57 = vmax.f32 %v792_v21, 0.0  ;;  %v2640_v62 = vmul.f32 %v1001_v48, %v910_v41 }
 0x107   : > { %v605_v44 = vadd.f32 %v585_v5, %v441_v7 }
 0x108   : > { %v1142_v33 = vrot.slane %v2640_v62, 2  ;;  %v865_v63 = vrot.slane %v812_v57, 1  ;;  %v1101_v2 = vrot.slane %v2640_v62, 1  ;;  %v1011_v48 = vpop.permute.xlu2 %1010 }
 0x10a   : > { %685 = vperm.xlu2 %2054, %v629_v3   ;;  %v1143_v51 = vsel %vm610_vm1, %v1140_v59, %v1142_v33  ;;  %v866_v8 = vsel %vm446_vm0, %v863_v34, %v865_v63  ;;  %v1102_v1 = vsel %vm446_vm0, %v1099_v36, %v1101_v2  ;;  %v1122_v36 = vrot.slane %v2676_v6, 2 }
 0x10b   : > { %2006 = vmatmul.msk.f32.vlgmr.msra.gmra.mxu3 %vm1221_vm2, %v1143_v51  ;;  %v911_v12 = vmax.f32 %v811_v53, %v866_v8  ;;  %v1119_v53 = vrot.slane %v2658_v11, 2 }
 0x10c   : > { %v714_v49 = vpop.permute.xlu1 %713 }
 0x10d   : > { %v749_v22 = vmul.f32 %v2486_v20, %v714_v49  ;;  %v946_v4 = vpop.permute.xlu0 %945  ;;  %v1256_v49 = vld [vmem:[%s3394_s4 + $0x70] sm:$0xff] }
 0x10e   : > { %v2662_v25 = vmul.f32 %v946_v4, %v899_v42 }
 0x10f   : > { %v769_v34 = vadd.f32 %v749_v22, %v605_v44 }
 0x110   : > { %v1079_v14 = vrot.slane %v2662_v25, 1  ;;  %v1120_v24 = vrot.slane %v2662_v25, 2 }
 0x111   : > { %v2669_v61 = vadd.f32 %v2504_v37, %v769_v34 }
 0x112   : > { %v1121_v58 = vsel %vm610_vm1, %v1119_v53, %v1120_v24  ;;  %v1080_v32 = vsel %vm446_vm0, %v1078_v56, %v1079_v14  ;;  %v1123_v5 = vsel %vm610_vm1, %v1120_v24, %v1122_v36  ;;  %v1082_v51 = vsel %vm446_vm0, %v1079_v14, %v1081_v23  ;;  %v1254_v24 = vld [vmem:[%s3394_s4 + $0x60] sm:$0xff] }
 0x113   : > { %v813_v47 = vmax.f32 %v2669_v61, 0.0  ;;  %1995 = vmatmul.msk.f32.vlgmr.msra.gmra.mxu1 %vm1221_vm2, %v1121_v58  ;;  %v2060_v40 = vpack.i.bf16 %v1080_v32, %v1102_v1  ;;  %v1253_v58 = vld [vmem:[%s3394_s4 + $0x58] sm:$0xff] }
 0x114   : > { %v554_v39 = vpop.permute.xlu1 %553 }
 0x115   : > { %v2682_v16 = vrot.slane %v813_v47, 1  ;;  %v1006_v42 = vpop.permute.xlu0 %1005  ;;  %2061 = vrot.lane.b32.xlu2 %v2060_v40, %s2119_s11  ;;  %v586_v3 = vmul.f32 %v2378_v52, %v554_v39  ;;  %v1252_v40 = vld [vmem:[%s3394_s4 + $0x50] sm:$0xff]  ;;  %v722_v39 = vpop.permute.xlu2 %721 }
 0x116   : > { %v2685_v9 = vmul.f32 %v1006_v42, %v911_v12 }
 0x117   : > { %v868_v60 = vsel %vm446_vm0, %v865_v63, %v2682_v16  ;;  %v1257_v63 = vld [vmem:[%s3394_s4 + $0x78] sm:$0xff] }
 0x118   : > { %v1103_v21 = vrot.slane %v2685_v9, 1  ;;  %v1144_v28 = vrot.slane %v2685_v9, 2  ;;  %v912_v41 = vmax.f32 %v812_v57, %v868_v60  ;;  %2017 = vmatpush.msra.mxu2 %v1257_v63  ;;  %1311 = vmatpush.msra.mxu0 %v1257_v63 }
 0x11a   : > { %v1145_v8 = vsel %vm610_vm1, %v1142_v33, %v1144_v28  ;;  %v1104_v57 = vsel %vm446_vm0, %v1101_v2, %v1103_v21  ;;  %v2707_v7 = vmul.f32 %v1011_v48, %v912_v41  ;;  %v442_v33 = vmul.f32 %v2382_v54, %v2417_v13  ;;  %2018 = vmatpush.msra.mxu2 %v1256_v49  ;;  %v1255_v2 = vld [vmem:[%s3394_s4 + $0x68] sm:$0xff] }
 0x11b   : > { %1996 = vmatmul.msk.f32.gmra.mxu1 %vm1221_vm2, %v1123_v5  ;;  %2007 = vmatmul.msk.f32.gmra.mxu3 %vm1221_vm2, %v1145_v8  ;;  %v2065_v12 = vpack.i.bf16 %v1082_v51, %v1104_v57  ;;  %v1251_v5 = vld [vmem:[%s3394_s4 + $0x48] sm:$0xff]  ;;  %v443_v51 = vmul.f32 %v2382_v54, %v2364_v46  ;;  %v1250_v46 = vld [vmem:[%s3394_s4 + $0x40] sm:$0xff] }
 0x11c   : > { %v674_v44 = vpop.permute.xlu1 %673  ;;  %1312 = vmatpush.msra.mxu0 %v1256_v49  ;;  %v606_v35 = vadd.f32 %v586_v3, %v442_v33  ;;  %v1146_v14 = vrot.slane %v2707_v7, 2  ;;  %2019 = vmatpush.msra.mxu2 %v1255_v2  ;;  %v1105_v3 = vrot.slane %v2707_v7, 1 }
 0x11d   : > { %v739_v22 = vmul.f32 %v2486_v20, %v674_v44  ;;  %v718_v4 = vpop.permute.xlu0 %717  ;;  %2066 = vrot.lane.b32.xlu2 %v2065_v12, %s2119_s11 }
 0x11e   : > { %v750_v34 = vmul.f32 %v2486_v20, %v718_v4  ;;  %1313 = vmatpush.msra.mxu0 %v1255_v2  ;;  %2020 = vmatpush.msra.mxu2 %v1254_v24  ;;  %v1249_v4 = vld [vmem:[%s3394_s4 + $0x38] sm:$0xff] }
 0x11f   : > { %v759_v13 = vadd.f32 %v739_v22, %v2460_v55  ;;  %v1147_v55 = vsel %vm610_vm1, %v1144_v28, %v1146_v14 }
 0x120   : > { %v770_v53 = vadd.f32 %v750_v34, %v606_v35  ;;  %1314 = vmatpush.msra.mxu0 %v1254_v24  ;;  %2021 = vmatpush.msra.mxu2 %v1253_v58 }
 0x121   : > { %v2728_v56 = vadd.f32 %v2504_v37, %v759_v13  ;;  %v562_v13 = vpop.permute.xlu2 %561 }
 0x122   : > { %v2734_v32 = vadd.f32 %v2504_v37, %v770_v53  ;;  %1315 = vmatpush.msra.mxu0 %v1253_v58  ;;  %2022 = vmatpush.msra.mxu2 %v1252_v40 }
 0x123   : > { %v803_v1 = vmax.f32 %v2728_v56, 0.0  ;;  %2008 = vmatmul.msk.f32.gmra.mxu3 %vm1221_vm2, %v1147_v55  ;;  %v1246_v55 = vld [vmem:[%s3394_s4 + $0x20] sm:$0xff] }
 0x124   : > { %v814_v42 = vmax.f32 %v2734_v32, 0.0  ;;  %v956_v60 = vpop.permute.xlu1 %955  ;;  %1316 = vmatpush.msra.mxu0 %v1252_v40  ;;  %2023 = vmatpush.msra.mxu2 %v1251_v5 }
 0x125   : > { %v2747_v41 = vrot.slane %v803_v1, 1  ;;  %v2750_v28 = vmul.f32 %v956_v60, %v2635_v45  ;;  %v558_v48 = vpop.permute.xlu0 %557  ;;  %v751_v45 = vmul.f32 %v2486_v20, %v722_v39  ;;  %v1245_v60 = vld [vmem:[%s3394_s4 + $0x18] sm:$0xff] }
 0x126   : > { %v869_v63 = vrot.slane %v814_v42, 1  ;;  %v587_v8 = vmul.f32 %v2378_v52, %v558_v48  ;;  %1317 = vmatpush.msra.mxu0 %v1251_v5  ;;  %2024 = vmatpush.msra.mxu2 %v1250_v46  ;;  %v588_v48 = vmul.f32 %v2378_v52, %v562_v13 }
 0x127   : > { %v1083_v57 = vrot.slane %v2750_v28, 1  ;;  %v1124_v12 = vrot.slane %v2750_v28, 2  ;;  %v848_v49 = vsel %vm446_vm0, %v2620_v27, %v2747_v41 }
 0x128   : > { %v607_v33 = vadd.f32 %v587_v8, %v443_v51  ;;  %v870_v44 = vsel %vm446_vm0, %v2682_v16, %v869_v63  ;;  %v902_v22 = vmax.f32 %v802_v18, %v848_v49  ;;  %1318 = vmatpush.msra.mxu0 %v1250_v46  ;;  %v1106_v18 = vsel %vm446_vm0, %v1103_v21, %v1105_v3  ;;  %v1248_v16 = vld [vmem:[%s3394_s4 + $0x30] sm:$0xff] }
 0x129   : > { %v1125_v27 = vsel %vm610_vm1, %v1122_v36, %v1124_v12  ;;  %v913_v2 = vmax.f32 %v813_v47, %v870_v44  ;;  %v1084_v43 = vsel %vm446_vm0, %v1081_v23, %v1083_v57  ;;  %2025 = vmatpush.msra.mxu2 %v1249_v4  ;;  %v1247_v47 = vld [vmem:[%s3394_s4 + $0x28] sm:$0xff]  ;;  %v1244_v51 = vld [vmem:[%s3394_s4 + $0x10] sm:$0xff] }
 0x12a   : > { %v771_v36 = vadd.f32 %v751_v45, %v607_v33  ;;  %1997 = vmatmul.msk.f32.gmra.mxu1 %vm1221_vm2, %v1125_v27  ;;  %v2070_v61 = vpack.i.bf16 %v1084_v43, %v1106_v18  ;;  %1319 = vmatpush.msra.mxu0 %v1249_v4  ;;  %v444_v45 = vmul.f32 %v2382_v54, %v2431_v31  ;;  %v1243_v27 = vld [vmem:[%s3394_s4 + $0x8] sm:$0xff] }
 0x12b   : > { %2026 = vmatpush.msra.mxu2 %v1248_v16 }
 0x12c   : > { %v2802_v23 = vadd.f32 %v2504_v37, %v771_v36  ;;  %v1016_v35 = vpop.permute.xlu1 %1015  ;;  %2071 = vrot.lane.b32.xlu2 %v2070_v61, %s2119_s11  ;;  %1320 = vmatpush.msra.mxu0 %v1248_v16  ;;  %v608_v33 = vadd.f32 %v588_v48, %v444_v45 }
 0x12d   : > { %v2805_v21 = vmul.f32 %v1016_v35, %v913_v2  ;;  %v678_v34 = vpop.permute.xlu0 %677  ;;  %2027 = vmatpush.msra.mxu2 %v1247_v47 }
 0x12e   : > { %v815_v24 = vmax.f32 %v2802_v23, 0.0  ;;  %v740_v53 = vmul.f32 %v2486_v20, %v678_v34  ;;  %1321 = vmatpush.msra.mxu0 %v1247_v47 }
 0x12f   : > { %v1148_v58 = vrot.slane %v2805_v21, 2  ;;  %2028 = vmatpush.msra.mxu2 %v1246_v55  ;;  %v1107_v31 = vrot.slane %v2805_v21, 1 }
 0x130   : > { %v760_v40 = vadd.f32 %v740_v53, %v2423_v26  ;;  %v871_v39 = vrot.slane %v815_v24, 1  ;;  %1322 = vmatpush.msra.mxu0 %v1246_v55 }
 0x131   : > { %v1149_v5 = vsel %vm610_vm1, %v1146_v14, %v1148_v58  ;;  %2029 = vmatpush.msra.mxu2 %v1245_v60 }
 0x132   : > { %v784_v8 = vadd.f32 %v2504_v37, %v760_v40  ;;  %2009 = vmatmul.msk.f32.gmra.mxu3 %vm1221_vm2, %v1149_v5  ;;  %v872_v26 = vsel %vm446_vm0, %v869_v63, %v871_v39  ;;  %1323 = vmatpush.msra.mxu0 %v1245_v60  ;;  %v1242_v63 = vld [vmem:[%s3394_s4] sm:$0xff] }
 0x133   : > { %v914_v49 = vmax.f32 %v814_v42, %v872_v26  ;;  %2030 = vmatpush.msra.mxu2 %v1244_v51 }
 0x134   : > { %v804_v14 = vmax.f32 %v784_v8, 0.0  ;;  %v726_v46 = vpop.permute.xlu1 %725  ;;  %1324 = vmatpush.msra.mxu0 %v1244_v51 }
 0x135   : > { %v752_v44 = vmul.f32 %v2486_v20, %v726_v46  ;;  %v961_v4 = vpop.permute.xlu0 %960  ;;  %2031 = vmatpush.msra.mxu2 %v1243_v27 }
 0x136   : > { %v849_v32 = vrot.slane %v804_v14, 1  ;;  %v2839_v42 = vmul.f32 %v961_v4, %v902_v22  ;;  %1325 = vmatpush.msra.mxu0 %v1243_v27 }
 0x137   : > { %v772_v2 = vadd.f32 %v752_v44, %v608_v33  ;;  %2032 = vmatpush.msra.mxu2 %v1242_v63 }
 0x138   : > { %v1085_v43 = vrot.slane %v2839_v42, 1  ;;  %v1126_v18 = vrot.slane %v2839_v42, 2  ;;  %v850_v16 = vsel %vm446_vm0, %v2747_v41, %v849_v32  ;;  %1326 = vmatpush.msra.mxu0 %v1242_v63  ;;  %v1108_v41 = vsel %vm446_vm0, %v1105_v3, %v1107_v31 }
 0x139   : > { %v2846_v36 = vadd.f32 %v2504_v37, %v772_v2  ;;  %v903_v61 = vmax.f32 %v803_v1, %v850_v16 }
 0x13a   : > { %v1127_v22 = vsel %vm610_vm1, %v1124_v12, %v1126_v18  ;;  %v1086_v47 = vsel %vm446_vm0, %v1083_v57, %v1085_v43 }
 0x13b   : > { %v816_v23 = vmax.f32 %v2846_v36, 0.0  ;;  %1998 = vmatmul.msk.f32.gmra.mxu1 %vm1221_vm2, %v1127_v22  ;;  %v2075_v35 = vpack.i.bf16 %v1086_v47, %v1108_v41 }
 0x13c   : > { %v1021_v56 = vpop.permute.xlu1 %1020 }
 0x13d   : > { %v2863_v1 = vrot.slane %v816_v23, 1  ;;  %v2865_v34 = vmul.f32 %v1021_v56, %v914_v49  ;;  %v682_v12 = vpop.permute.xlu0 %681  ;;  %2076 = vrot.lane.b32.xlu0 %v2075_v35, %s2119_s11 }
 0x13e   : > { %v741_v57 = vmul.f32 %v2486_v20, %v682_v12 }
 0x13f   : > { %v1150_v13 = vrot.slane %v2865_v34, 2  ;;  %v874_v3 = vsel %vm446_vm0, %v871_v39, %v2863_v1  ;;  %v1109_v8 = vrot.slane %v2865_v34, 1 }
 0x140   : > { %v761_v53 = vadd.f32 %v741_v57, %v2480_v19  ;;  %v915_v55 = vmax.f32 %v815_v24, %v874_v3 }
 0x141   : > { %v1151_v40 = vsel %vm610_vm1, %v1148_v58, %v1150_v13  ;;  %v1110_v33 = vsel %vm446_vm0, %v1107_v31, %v1109_v8 }
 0x142   : > { %v2875_v60 = vadd.f32 %v2504_v37, %v761_v53  ;;  %2010 = vmatmul.msk.f32.gmra.mxu3 %vm1221_vm2, %v1151_v40 }
 0x144   : > { %v805_v48 = vmax.f32 %v2875_v60, 0.0  ;;  %v731_v5 = vpop.permute.xlu1 %730 }
 0x145   : > { %v966_v51 = vpop.permute.xlu0 %965  ;;  %v753_v53 = vmul.f32 %v2486_v20, %v731_v5 }
 0x146   : > { %v851_v26 = vrot.slane %v805_v48, 1  ;;  %v2882_v39 = vmul.f32 %v966_v51, %v903_v61 }
 0x148   : > { %v1087_v19 = vrot.slane %v2882_v39, 1  ;;  %v1128_v24 = vrot.slane %v2882_v39, 2  ;;  %v852_v58 = vsel %vm446_vm0, %v849_v32, %v851_v26 }
 0x149   : > { %v904_v45 = vmax.f32 %v804_v14, %v852_v58 }
 0x14a   : > { %v1129_v49 = vsel %vm610_vm1, %v1126_v18, %v1128_v24  ;;  %v1088_v46 = vsel %vm446_vm0, %v1085_v43, %v1087_v19 }
 0x14b   : > { %1999 = vmatmul.msk.f32.gmra.mxu1 %vm1221_vm2, %v1129_v49  ;;  %v2080_v44 = vpack.i.bf16 %v1088_v46, %v1110_v33 }
 0x14c   : > { %v971_v4 = vpop.permute.xlu1 %970 }
 0x14d   : > { %v2891_v27 = vmul.f32 %v971_v4, %v904_v45  ;;  %v1026_v63 = vpop.permute.xlu0 %1025  ;;  %2081 = vrot.lane.b32.xlu1 %v2080_v44, %s2119_s11 }
 0x14e   : > { %v2894_v2 = vmul.f32 %v1026_v63, %v915_v55 }
 0x14f   : > { %v1089_v32 = vrot.slane %v2891_v27, 1  ;;  %v1130_v14 = vrot.slane %v2891_v27, 2 }
 0x150   : > { %v1111_v18 = vrot.slane %v2894_v2, 1  ;;  %v1152_v43 = vrot.slane %v2894_v2, 2 }
 0x151   : > { %v1131_v31 = vsel %vm610_vm1, %v1128_v24, %v1130_v14  ;;  %v1090_v16 = vsel %vm446_vm0, %v1087_v19, %v1089_v32 }
 0x152   : > { %v1153_v61 = vsel %vm610_vm1, %v1150_v13, %v1152_v43  ;;  %v1112_v22 = vsel %vm446_vm0, %v1109_v8, %v1111_v18  ;;  %v445_v13 = vmul.f32 %v2382_v54, %v2429_v29 }
 0x153   : > { %2000 = vmatmul.msk.f32.gmra.mxu1 %vm1221_vm2, %v1131_v31  ;;  %2011 = vmatmul.msk.f32.gmra.mxu3 %vm1221_vm2, %v1153_v61  ;;  %v2085_v47 = vpack.i.bf16 %v1090_v16, %v1112_v22 }
 0x154   : > { %v2057_v41 = vpop.permute.xlu2 %2056  ;;  %v976_v49 = vpop.permute.xlu1 %975 }
 0x155   : > { %v2058_v35 = vunpack.i.l.bf16 %v2057_v41  ;;  %2086 = vrot.lane.b32.xlu2 %v2085_v47, %s2119_s11  ;;  %v2059_v12 = vunpack.i.h.bf16 %v2057_v41  ;;  %v1031_v8 = vpop.permute.xlu0 %1030 }
 0x157   : > { %v1231_v56 = vsel %vm1221_vm2, %v2581_v17, %v2058_v35  ;;  %v1232_v40 = vsel %vm1221_vm2, %v2579_v15, %v2059_v12 }
 0x158   : > { %1354 = vmatmul.f32.vlgmr.msra.gmra.mxu2 %v1231_v56 }
 0x15c   : > { %v567_v57 = vpop.permute.xlu2 %566  ;;  %v981_v41 = vpop.permute.xlu1 %980 }
 0x15d   : > { %v589_v3 = vmul.f32 %v2378_v52, %v567_v57  ;;  %v1036_v63 = vpop.permute.xlu0 %1035 }
 0x15f   : > { %v609_v55 = vadd.f32 %v589_v3, %v445_v13 }
 0x160   : > { %1357 = vmatmul.f32.gmra.mxu2 %v1232_v40 }
 0x161   : > { %v773_v51 = vadd.f32 %v753_v53, %v609_v55 }
 0x163   : > { %v797_v19 = vadd.f32 %v2504_v37, %v773_v51 }
 0x164   : > { %v686_v24 = vpop.permute.xlu2 %685 }
 0x165   : > { %v817_v58 = vmax.f32 %v797_v19, 0.0  ;;  %v742_v45 = vmul.f32 %v2486_v20, %v686_v24 }
 0x167   : > { %v875_v46 = vrot.slane %v817_v58, 1  ;;  %v762_v54 = vadd.f32 %v742_v45, %v2475_v10 }
 0x169   : > { %v876_v52 = vsel %vm446_vm0, %v2863_v1, %v875_v46  ;;  %v897_v29 = vsel %vm446_vm0, %v875_v46, 0.0  ;;  %v786_v5 = vadd.f32 %v2504_v37, %v762_v54 }
 0x16a   : > { %v916_v33 = vmax.f32 %v816_v23, %v876_v52  ;;  %v917_v44 = vmax.f32 %v817_v58, %v897_v29 }
 0x16b   : > { %v806_v4 = vmax.f32 %v786_v5, 0.0  ;;  %v1136_v5 = vrot.slane %v2581_v17, 2 }
 0x16c   : > { %v2930_v31 = vmul.f32 %v1031_v8, %v916_v33  ;;  %v2932_v20 = vmul.f32 %v1036_v63, %v917_v44 }
 0x16d   : > { %v853_v16 = vrot.slane %v806_v4, 1 }
 0x16e   : > { %v1154_v10 = vrot.slane %v2930_v31, 2  ;;  %v1115_v35 = vrot.slane %v2932_v20, 1  ;;  %v1113_v12 = vrot.slane %v2930_v31, 1  ;;  %v1156_v3 = vrot.slane %v2932_v20, 2 }
 0x16f   : > { %v854_v61 = vsel %vm446_vm0, %v851_v26, %v853_v16  ;;  %v856_v1 = vsel %vm446_vm0, %v853_v16, %v2543_v38  ;;  %v2062_v22 = vpop.permute.xlu2 %2061  ;;  %v1138_v16 = vrot.slane %v2579_v15, 2 }
 0x170   : > { %v905_v37 = vmax.f32 %v805_v48, %v854_v61  ;;  %v906_v36 = vmax.f32 %v806_v4, %v856_v1  ;;  %v2064_v23 = vunpack.i.h.bf16 %v2062_v22  ;;  %v2063_v47 = vunpack.i.l.bf16 %v2062_v22 }
 0x171   : > { %v1155_v56 = vsel %vm610_vm1, %v1152_v43, %v1154_v10  ;;  %v1118_v53 = vsel %vm446_vm0, %v1115_v35, 0.0  ;;  %v1116_v55 = vsel %vm446_vm0, %v1113_v12, %v1115_v35  ;;  %v1159_v29 = vsel %vm610_vm1, %v1156_v3, 0.0 }
 0x172   : > { %v2943_v57 = vmul.f32 %v981_v41, %v906_v36  ;;  %2012 = vmatmul.msk.f32.gmra.mxu3 %vm1221_vm2, %v1155_v56  ;;  %v1222_v38 = vsel %vm1221_vm2, %v2658_v11, %v2064_v23  ;;  %v1233_v60 = vsel %vm1221_vm2, %v2589_v30, %v2063_v47  ;;  %v2950_v48 = vmul.f32 %v976_v49, %v905_v37 }
 0x173   : > { %1327 = vmatmul.f32.vlgmr.msra.gmra.mxu0 %v1222_v38  ;;  %1360 = vmatmul.f32.gmra.mxu2 %v1233_v60  ;;  %v1114_v11 = vsel %vm446_vm0, %v1111_v18, %v1113_v12  ;;  %v1141_v17 = vsel %vm610_vm1, %v1138_v16, %v1140_v59 }
 0x174   : > { %v1132_v26 = vrot.slane %v2950_v48, 2  ;;  %v1093_v43 = vrot.slane %v2943_v57, 1  ;;  %v1091_v13 = vrot.slane %v2950_v48, 1  ;;  %v1134_v54 = vrot.slane %v2943_v57, 2 }
 0x176   : > { %v1133_v40 = vsel %vm610_vm1, %v1130_v14, %v1132_v26  ;;  %v1096_v51 = vsel %vm446_vm0, %v1093_v43, %v1095_v50  ;;  %v1094_v8 = vsel %vm446_vm0, %v1091_v13, %v1093_v43  ;;  %v1092_v19 = vsel %vm446_vm0, %v1089_v32, %v1091_v13 }
 0x177   : > { %2001 = vmatmul.msk.f32.gmra.mxu1 %vm1221_vm2, %v1133_v40  ;;  %v2067_v24 = vpop.permute.xlu2 %2066  ;;  %v2100_v58 = vpack.i.bf16 %v1096_v51, %v1118_v53  ;;  %v2095_v45 = vpack.i.bf16 %v1094_v8, %v1116_v55  ;;  %v2090_v18 = vpack.i.bf16 %v1092_v19, %v1114_v11  ;;  %v1157_v14 = vsel %vm610_vm1, %v1154_v10, %v1156_v3 }
 0x178   : > { %v2069_v49 = vunpack.i.h.bf16 %v2067_v24  ;;  %v2068_v46 = vunpack.i.l.bf16 %v2067_v24  ;;  %v1135_v52 = vsel %vm610_vm1, %v1132_v26, %v1134_v54  ;;  %v1137_v33 = vsel %vm610_vm1, %v1134_v54, %v1136_v5 }
 0x179   : > { %2101 = vrot.lane.b32.xlu2 %v2100_v58, %s2119_s11  ;;  %2096 = vrot.lane.b32.xlu1 %v2095_v45, %s2119_s11  ;;  %v1139_v10 = vsel %vm610_vm1, %v1136_v5, %v1138_v16 }
 0x17a   : > { %2013 = vmatmul.msk.f32.gmra.mxu3 %vm1221_vm2, %v1157_v14  ;;  %2091 = vrot.lane.b32.xlu0 %v2090_v18, %s2119_s11  ;;  %v1223_v50 = vsel %vm1221_vm2, %v2662_v25, %v2069_v49  ;;  %v1234_v32 = vsel %vm1221_vm2, %v2640_v62, %v2068_v46 }
 0x17b   : > { %1330 = vmatmul.f32.gmra.mxu0 %v1223_v50  ;;  %1363 = vmatmul.f32.gmra.mxu2 %v1234_v32 }
 0x17f   : > { %2002 = vmatmul.msk.f32.gmra.mxu1 %vm1221_vm2, %v1135_v52 }
 0x182   : > { %2014 = vmatmul.msk.f32.gmra.mxu3 %vm1221_vm2, %v1159_v29 }
 0x186   : > { %v2072_v25 = vpop.permute.xlu2 %2071 }
 0x187   : > { %2003 = vmatmul.msk.f32.gmra.mxu1 %vm1221_vm2, %v1137_v33  ;;  %v2074_v62 = vunpack.i.h.bf16 %v2072_v25  ;;  %v2073_v44 = vunpack.i.l.bf16 %v2072_v25 }
 0x189   : > { %v1224_v4 = vsel %vm1221_vm2, %v2676_v6, %v2074_v62  ;;  %v1235_v63 = vsel %vm1221_vm2, %v2685_v9, %v2073_v44 }
 0x18a   : > { %1333 = vmatmul.f32.gmra.mxu0 %v1224_v4  ;;  %1366 = vmatmul.f32.gmra.mxu2 %v1235_v63 }
 0x18e   : > { %v1438_v4 = vpop.f32.mrf.mxu3 }
 0x18f   : > { %2004 = vmatmul.msk.f32.gmra.mxu1 %vm1221_vm2, %v1139_v10 }
 0x190   : > { %v3004_v37 = vpop.f32.mrf.mxu1 }
 0x197   : > { %2005 = vmatmul.msk.f32.gmra.mxu1 %vm1221_vm2, %v1141_v17 }
 0x198   : > { %v1408_v35 = vpop.f32.mrf.mxu1 }
 0x1a7   : > { %v1411_v12 = vpop.f32.mrf.mxu1 }
 0x1af   : > { %v2077_v61 = vpop.permute.xlu0 %2076  ;;  %v2087_v47 = vpop.permute.xlu2 %2086 }
 0x1b0   : > { %v2079_v1 = vunpack.i.h.bf16 %v2077_v61  ;;  %v2078_v6 = vunpack.i.l.bf16 %v2077_v61  ;;  %v2088_v41 = vunpack.i.l.bf16 %v2087_v47 }
 0x1b2   : > { %v1225_v9 = vsel %vm1221_vm2, %v2750_v28, %v2079_v1  ;;  %v1236_v22 = vsel %vm1221_vm2, %v2707_v7, %v2078_v6  ;;  %v2089_v28 = vunpack.i.h.bf16 %v2087_v47  ;;  %v1238_v56 = vsel %vm1221_vm2, %v2865_v34, %v2088_v41  ;;  %v1441_v1 = vpop.f32.mrf.mxu3 }
 0x1b3   : > { %1336 = vmatmul.f32.gmra.mxu0 %v1225_v9  ;;  %1369 = vmatmul.f32.gmra.mxu2 %v1236_v22 }
 0x1b4   : > { %v1227_v7 = vsel %vm1221_vm2, %v2882_v39, %v2089_v28 }
 0x1b8   : > { %v3014_v38 = vpop.f32.mrf.mxu1 }
 0x1bf   : > { %v2082_v15 = vpop.permute.xlu1 %2081 }
 0x1c0   : > { %v2084_v36 = vunpack.i.h.bf16 %v2082_v15  ;;  %v2083_v30 = vunpack.i.l.bf16 %v2082_v15 }
 0x1c2   : > { %v1226_v59 = vsel %vm1221_vm2, %v2839_v42, %v2084_v36  ;;  %v1237_v23 = vsel %vm1221_vm2, %v2805_v21, %v2083_v30 }
 0x1c3   : > { %1339 = vmatmul.f32.gmra.mxu0 %v1226_v59  ;;  %1372 = vmatmul.f32.gmra.mxu2 %v1237_v23 }
 0x1c8   : > { %v3016_v42 = vpop.f32.mrf.mxu1 }
 0x1cb   : > { %1342 = vmatmul.f32.gmra.mxu0 %v1227_v7  ;;  %1375 = vmatmul.f32.gmra.mxu2 %v1238_v56 }
 0x1d0   : > { %v3018_v21 = vpop.f32.mrf.mxu1 }
 0x1d3   : > { %v2102_v51 = vpop.permute.xlu2 %2101 }
 0x1d4   : > { %v2103_v8 = vunpack.i.l.bf16 %v2102_v51 }
 0x1d6   : > { %v1241_v24 = vsel %vm1221_vm2, %v2932_v20, %v2103_v8 }
 0x1eb   : > { %v2097_v3 = vpop.permute.xlu1 %2096 }
 0x1ec   : > { %v2092_v60 = vpop.permute.xlu0 %2091  ;;  %v2099_v34 = vunpack.i.h.bf16 %v2097_v3  ;;  %v2098_v53 = vunpack.i.l.bf16 %v2097_v3 }
 0x1ed   : > { %v2094_v26 = vunpack.i.h.bf16 %v2092_v60  ;;  %v2093_v43 = vunpack.i.l.bf16 %v2092_v60 }
 0x1ee   : > { %v1229_v11 = vsel %vm1221_vm2, %v2950_v48, %v2099_v34  ;;  %v1240_v40 = vsel %vm1221_vm2, %v2930_v31, %v2098_v53  ;;  %v1355_v48 = vpop.f32.mrf.mxu2  ;;  %v3041_v31 = vld [vmem:[%s3395_s5] ss:$0 sm:$0xff] }
 0x1ef   : > { %v1228_v13 = vsel %vm1221_vm2, %v2891_v27, %v2094_v26  ;;  %v1239_v39 = vsel %vm1221_vm2, %v2894_v2, %v2093_v43  ;;  %v2104_v27 = vunpack.i.h.bf16 %v2102_v51  ;;  %v1356_v18 = vadd.f32 %v3041_v31, %v1355_v48  ;;  %v3080_v53 = vld [vmem:[%s3396_s6] sm:$0xff] }
 0x1f0   : > { %1345 = vmatmul.f32.gmra.mxu0 %v1228_v13  ;;  %1378 = vmatmul.f32.gmra.mxu2 %v1239_v39  ;;  %v1328_v45 = vpop.f32.mrf.mxu0 }
 0x1f1   : > { %v1230_v2 = vsel %vm1221_vm2, %v2943_v57, %v2104_v27  ;;  %v1329_v10 = vadd.f32 %v3041_v31, %v1328_v45  ;;  %v3101_v27 = vld [vmem:[%s3396_s6 + $0x30] sm:$0xff]  ;;  %v3114_v45 = vld [vmem:[%s3396_s6 + $0x58] sm:$0xff] }
 0x1f3   : > { %v1406_v9 = vadd.f32 %v3004_v37, %v1329_v10 }
 0x1f4   : > { %v3024_v55 = vpop.f32.mrf.mxu1 }
 0x1f5   : > { %v1465_v30 = vmax.f32 %v1406_v9, 0.0 }
 0x1f6   : > { %v1358_v14 = vpop.f32.mrf.mxu2 }
 0x1f7   : > { %v1359_v57 = vadd.f32 %v3041_v31, %v1358_v14  ;;  %v1505_v7 = vrot.slane %v1465_v30, 1 }
 0x1f8   : > { %1348 = vmatmul.f32.gmra.mxu0 %v1229_v11  ;;  %1381 = vmatmul.f32.gmra.mxu2 %v1240_v40  ;;  %v1331_v50 = vpop.f32.mrf.mxu0  ;;  %v3085_v11 = vld [vmem:[%s3396_s6 + $0x28] sm:$0xff]  ;;  %v3090_v40 = vld [vmem:[%s3396_s6 + $0x50] sm:$0xff] }
 0x1f9   : > { %v1332_v16 = vadd.f32 %v3041_v31, %v1331_v50 }
 0x1fb   : > { %v1409_v61 = vadd.f32 %v1408_v35, %v1332_v16  ;;  %v1444_v35 = vpop.f32.mrf.mxu3 }
 0x1fc   : > { %v3030_v19 = vpop.f32.mrf.mxu1 }
 0x1fd   : > { %v1466_v15 = vmax.f32 %v1409_v61, 0.0 }
 0x1fe   : > { %v1361_v25 = vpop.f32.mrf.mxu2 }
 0x1ff   : > { %v1362_v36 = vadd.f32 %v3041_v31, %v1361_v25  ;;  %v1506_v23 = vrot.slane %v1466_v15, 1 }
 0x200   : > { %1351 = vmatmul.f32.gmra.mxu0 %v1230_v2  ;;  %1384 = vmatmul.f32.gmra.mxu2 %v1241_v24  ;;  %v3108_v2 = vld [vmem:[%s3396_s6 + $0x78] sm:$0xff] }
 0x201   : > { %v3065_v28 = vadd.f32 %v1438_v4, %v1362_v36  ;;  %v1507_v60 = vsel %vm446_vm0, %v1505_v7, %v1506_v23  ;;  %v3149_v36 = vld [vmem:[%s3396_s6 + $0x38] sm:$0xff] }
 0x202   : > { %v1565_v34 = vmax.f32 %v1465_v30, %v1507_v60  ;;  %v3154_v30 = vld [vmem:[%s3396_s6 + $0x60] sm:$0xff] }
 0x203   : > { %v1476_v13 = vmax.f32 %v3065_v28, 0.0 }
 0x204   : > { %v3036_v58 = vpop.f32.mrf.mxu1  ;;  %v1605_v25 = vmul.f32 %v3080_v53, %v1565_v34  ;;  %v1615_v4 = vmul.f32 %v3090_v40, %v1565_v34 }
 0x205   : > { %v1526_v48 = vrot.slane %v1476_v13, 1 }
 0x206   : > { %v1364_v6 = vpop.f32.mrf.mxu2 }
 0x207   : > { %v1334_v62 = vpop.f32.mrf.mxu0  ;;  %v1365_v47 = vadd.f32 %v3041_v31, %v1364_v6  ;;  %v3144_v6 = vld [vmem:[%s3396_s6 + $0x10] sm:$0xff] }
 0x208   : > { %v1335_v63 = vadd.f32 %v3041_v31, %v1334_v62  ;;  %v1610_v62 = vmul.f32 %v3085_v11, %v1565_v34 }
 0x209   : > { %v3069_v37 = vadd.f32 %v1441_v1, %v1365_v47 }
 0x20a   : > { %v1412_v17 = vadd.f32 %v1411_v12, %v1335_v63  ;;  %v1620_v63 = vmul.f32 %v3108_v2, %v1565_v34 }
 0x20b   : > { %v1477_v51 = vmax.f32 %v3069_v37, 0.0 }
 0x20c   : > { %v1432_v49 = vpop.f32.mrf.mxu1  ;;  %v1467_v22 = vmax.f32 %v1412_v17, 0.0 }
 0x20d   : > { %v1433_v46 = vadd.f32 %v1432_v49, %v1356_v18  ;;  %v3119_v18 = vld [vmem:[%s3396_s6 + $0x80] sm:$0xff]  ;;  %v1528_v16 = vrot.slane %v1477_v51, 1 }
 0x20e   : > { %v1508_v59 = vrot.slane %v1467_v22, 1  ;;  %v1367_v41 = vpop.f32.mrf.mxu2 }
 0x20f   : > { %v1474_v32 = vmax.f32 %v1433_v46, 0.0  ;;  %v1368_v26 = vadd.f32 %v3041_v31, %v1367_v41 }
 0x210   : > { %v1509_v56 = vsel %vm446_vm0, %v1506_v23, %v1508_v59 }
 0x211   : > { %v3048_v29 = vrot.slane %v1474_v32, 1  ;;  %v1566_v39 = vmax.f32 %v1466_v15, %v1509_v56  ;;  %v3103_v8 = vadd.f32 %v1444_v35, %v1368_v26  ;;  %v1529_v35 = vsel %vm446_vm0, %v1526_v48, %v1528_v16 }
 0x212   : > { %v1576_v34 = vmax.f32 %v1476_v13, %v1529_v35 }
 0x213   : > { %v1611_v46 = vmul.f32 %v3101_v27, %v1566_v39  ;;  %v1621_v50 = vmul.f32 %v3119_v18, %v1566_v39  ;;  %v1478_v10 = vmax.f32 %v3103_v8, 0.0 }
 0x214   : > { %v1435_v20 = vpop.f32.mrf.mxu1 }
 0x215   : > { %v3045_v54 = vadd.f32 %v1435_v20, %v1359_v57  ;;  %v1616_v57 = vmul.f32 %v3114_v45, %v1566_v39 }
 0x217   : > { %v1475_v52 = vmax.f32 %v3045_v54, 0.0  ;;  %v1705_v47 = vadd.f32 %v1616_v57, %v1615_v4 }
 0x219   : > { %v3052_v5 = vrot.slane %v1475_v52, 1 }
 0x21b   : > { %v1525_v33 = vsel %vm446_vm0, %v3048_v29, %v3052_v5  ;;  %v1527_v1 = vsel %vm446_vm0, %v3052_v5, %v1526_v48  ;;  %v3159_v5 = vld [vmem:[%s3396_s6 + $0x88] sm:$0xff] }
 0x21c   : > { %v3057_v44 = vmax.f32 %v1474_v32, %v1525_v33  ;;  %v1447_v33 = vpop.f32.mrf.mxu3  ;;  %v1575_v60 = vmax.f32 %v1475_v52, %v1527_v1 }
 0x21e   : > { %v1645_v57 = vmul.f32 %v3080_v53, %v1575_v60  ;;  %v1650_v48 = vmul.f32 %v3085_v11, %v1575_v60  ;;  %v1660_v4 = vmul.f32 %v3108_v2, %v1575_v60 }
 0x230   : > { %v1337_v12 = vpop.f32.mrf.mxu0 }
 0x231   : > { %v1338_v43 = vadd.f32 %v3041_v31, %v1337_v12  ;;  %v1530_v12 = vrot.slane %v1478_v10, 1 }
 0x233   : > { %v3075_v3 = vadd.f32 %v3014_v38, %v1338_v43  ;;  %v3096_v38 = vld [vmem:[%s3396_s6 + $0x8] sm:$0xff] }
 0x234   : > { %v1606_v49 = vmul.f32 %v3096_v38, %v1566_v39 }
 0x235   : > { %v1468_v24 = vmax.f32 %v3075_v3, 0.0 }
 0x236   : > { %v1370_v14 = vpop.f32.mrf.mxu2  ;;  %v1685_v9 = vadd.f32 %v1606_v49, %v1605_v25  ;;  %v1655_v25 = vmul.f32 %v3090_v40, %v1575_v60 }
 0x237   : > { %v3127_v20 = vrot.slane %v1468_v24, 1  ;;  %v1371_v32 = vadd.f32 %v3041_v31, %v1370_v14 }
 0x239   : > { %v1511_v17 = vsel %vm446_vm0, %v1508_v59, %v3127_v20  ;;  %v3137_v61 = vadd.f32 %v1447_v33, %v1371_v32  ;;  %v1695_v59 = vadd.f32 %v1611_v46, %v1610_v62  ;;  %v1531_v46 = vsel %vm446_vm0, %v1528_v16, %v1530_v12 }
 0x23a   : > { %v1567_v15 = vmax.f32 %v1467_v22, %v1511_v17  ;;  %v1715_v22 = vadd.f32 %v1621_v50, %v1620_v63  ;;  %v1577_v52 = vmax.f32 %v1477_v51, %v1531_v46  ;;  %v1646_v50 = vmul.f32 %v3096_v38, %v1576_v34 }
 0x23b   : > { %v1479_v23 = vmax.f32 %v3137_v61, 0.0  ;;  %v1651_v32 = vmul.f32 %v3101_v27, %v1576_v34  ;;  %v1656_v62 = vmul.f32 %v3114_v45, %v1576_v34 }
 0x23c   : > { %v1607_v28 = vmul.f32 %v3144_v6, %v1567_v15  ;;  %v1612_v41 = vmul.f32 %v3149_v36, %v1567_v15  ;;  %v1617_v7 = vmul.f32 %v3154_v30, %v1567_v15  ;;  %v1622_v56 = vmul.f32 %v3159_v5, %v1567_v15 }
 0x23d   : > { %v1532_v8 = vrot.slane %v1479_v23, 1  ;;  %v1765_v63 = vadd.f32 %v1646_v50, %v1645_v57  ;;  %v1775_v17 = vadd.f32 %v1651_v32, %v1650_v48  ;;  %v1647_v15 = vmul.f32 %v3144_v6, %v1577_v52 }
 0x23e   : > { %v1686_v37 = vadd.f32 %v1685_v9, %v1607_v28  ;;  %v1696_v26 = vadd.f32 %v1695_v59, %v1612_v41  ;;  %v1706_v43 = vadd.f32 %v1705_v47, %v1617_v7  ;;  %v1716_v39 = vadd.f32 %v1715_v22, %v1622_v56  ;;  %v1450_v9 = vpop.f32.mrf.mxu3  ;;  %v3193_v28 = vld [vmem:[%s3396_s6 + $0x18] sm:$0xff] }
 0x23f   : > { %v1533_v13 = vsel %vm446_vm0, %v1530_v12, %v1532_v8  ;;  %v1652_v59 = vmul.f32 %v3149_v36, %v1577_v52  ;;  %v1657_v47 = vmul.f32 %v3154_v30, %v1577_v52  ;;  %v1661_v22 = vmul.f32 %v3119_v18, %v1576_v34  ;;  %v3204_v34 = vld [vmem:[%s3396_s6 + $0x40] sm:$0xff] }
 0x240   : > { %v1340_v49 = vpop.f32.mrf.mxu0  ;;  %v1766_v12 = vadd.f32 %v1765_v63, %v1647_v15  ;;  %v1785_v60 = vadd.f32 %v1656_v62, %v1655_v25 }
 0x241   : > { %v1341_v14 = vadd.f32 %v3041_v31, %v1340_v49  ;;  %v1795_v49 = vadd.f32 %v1661_v22, %v1660_v4 }
 0x243   : > { %v3176_v54 = vadd.f32 %v3016_v42, %v1341_v14  ;;  %v1578_v42 = vmax.f32 %v1478_v10, %v1533_v13  ;;  %v1662_v10 = vmul.f32 %v3159_v5, %v1577_v52  ;;  %v3211_v14 = vld [vmem:[%s3396_s6 + $0x68] sm:$0xff]  ;;  %v3221_v52 = vld [vmem:[%s3396_s6 + $0x90] sm:$0xff] }
 0x244   : > { %3404 = vst [vmem:[#allocation2_spill] sm:$0xff] %v3221_v52 }
 0x245   : > { %v1469_v33 = vmax.f32 %v3176_v54, 0.0  ;;  %v1648_v57 = vmul.f32 %v3193_v28, %v1578_v42  ;;  %v1653_v32 = vmul.f32 %v3204_v34, %v1578_v42  ;;  %v1658_v62 = vmul.f32 %v3211_v14, %v1578_v42 }
 0x246   : > { %v1373_v16 = vpop.f32.mrf.mxu2  ;;  %v1796_v22 = vadd.f32 %v1795_v49, %v1662_v10 }
 0x247   : > { %v1512_v1 = vrot.slane %v1469_v33, 1  ;;  %v1374_v51 = vadd.f32 %v3041_v31, %v1373_v16  ;;  %v1767_v61 = vadd.f32 %v1766_v12, %v1648_v57 }
 0x248   : > { %v1343_v41 = vpop.f32.mrf.mxu0 }
 0x249   : > { %v1513_v7 = vsel %vm446_vm0, %v3127_v20, %v1512_v1  ;;  %v3198_v56 = vadd.f32 %v1450_v9, %v1374_v51  ;;  %v1344_v35 = vadd.f32 %v3041_v31, %v1343_v41  ;;  %v1776_v20 = vadd.f32 %v1775_v17, %v1652_v59 }
 0x24a   : > { %v1568_v46 = vmax.f32 %v1468_v24, %v1513_v7  ;;  %v1786_v51 = vadd.f32 %v1785_v60, %v1657_v47  ;;  %v1663_v59 = vmul.f32 %v3221_v52, %v1578_v42  ;;  %v3263_v47 = vld [vmem:[%s3396_s6 + $0x98] sm:$0xff] }
 0x24b   : > { %v3401_v48 = vmax.f32 %v3198_v56, 0.0  ;;  %v3216_v54 = vadd.f32 %v3018_v21, %v1344_v35 }
 0x24c   : > { %v1608_v3 = vmul.f32 %v3193_v28, %v1568_v46  ;;  %v1613_v24 = vmul.f32 %v3204_v34, %v1568_v46  ;;  %v1618_v50 = vmul.f32 %v3211_v14, %v1568_v46  ;;  %v1623_v13 = vmul.f32 %v3221_v52, %v1568_v46 }
 0x24d   : > { %v3230_v25 = vrot.slane %v3401_v48, 1  ;;  %v3400_v21 = vmax.f32 %v3216_v54, 0.0  ;;  %v1797_v60 = vadd.f32 %v1796_v22, %v1663_v59 }
 0x24e   : > { %v1687_v4 = vadd.f32 %v1686_v37, %v1608_v3  ;;  %v1697_v63 = vadd.f32 %v1696_v26, %v1613_v24  ;;  %v1707_v16 = vadd.f32 %v1706_v43, %v1618_v50  ;;  %v1717_v17 = vadd.f32 %v1716_v39, %v1623_v13  ;;  %v3246_v37 = vld [vmem:[%s3396_s6 + $0x20] sm:$0xff]  ;;  %v3251_v26 = vld [vmem:[%s3396_s6 + $0x48] sm:$0xff]  ;;  %v3258_v39 = vld [vmem:[%s3396_s6 + $0x70] sm:$0xff] }
 0x24f   : > { %v1535_v9 = vsel %vm446_vm0, %v1532_v8, %v3230_v25  ;;  %v3238_v15 = vrot.slane %v3400_v21, 1  ;;  %v1787_v8 = vadd.f32 %v1786_v51, %v1658_v62 }
 0x250   : > { %v1579_v41 = vmax.f32 %v1479_v23, %v1535_v9  ;;  %v1777_v23 = vadd.f32 %v1776_v20, %v1653_v32 }
 0x251   : > { %v1515_v43 = vsel %vm446_vm0, %v1512_v1, %v3238_v15 }
 0x252   : > { %v1569_v42 = vmax.f32 %v1469_v33, %v1515_v43  ;;  %v1649_v10 = vmul.f32 %v3246_v37, %v1579_v41  ;;  %v1654_v7 = vmul.f32 %v3251_v26, %v1579_v41  ;;  %v1659_v1 = vmul.f32 %v3258_v39, %v1579_v41 }
 0x253   : > { %v1664_v35 = vmul.f32 %v3263_v47, %v1579_v41 }
 0x254   : > { %v1768_v49 = vadd.f32 %v1767_v61, %v1649_v10  ;;  %v1778_v46 = vadd.f32 %v1777_v23, %v1654_v7  ;;  %v1788_v12 = vadd.f32 %v1787_v8, %v1659_v1  ;;  %v1609_v20 = vmul.f32 %v3246_v37, %v1569_v42 }
 0x255   : > { %v1798_v33 = vadd.f32 %v1797_v60, %v1664_v35  ;;  %v1614_v57 = vmul.f32 %v3251_v26, %v1569_v42  ;;  %v1619_v3 = vmul.f32 %v3258_v39, %v1569_v42  ;;  %v1624_v59 = vmul.f32 %v3263_v47, %v1569_v42 }
 0x256   : > { %v1769_v24 = vrot.slane %v1768_v49, 4  ;;  %v1779_v50 = vrot.slane %v1778_v46, 4  ;;  %v1789_v13 = vrot.slane %v1788_v12, 4  ;;  %v1688_v62 = vadd.f32 %v1687_v4, %v1609_v20 }
 0x257   : > { %v1799_v32 = vrot.slane %v1798_v33, 4  ;;  %v1698_v51 = vadd.f32 %v1697_v63, %v1614_v57  ;;  %v1708_v8 = vadd.f32 %v1707_v16, %v1619_v3  ;;  %v1718_v4 = vadd.f32 %v1717_v17, %v1624_v59 }
 0x258   : > { %v1770_v9 = vadd.f32 %v1769_v24, %v1768_v49  ;;  %v1780_v43 = vadd.f32 %v1779_v50, %v1778_v46  ;;  %v1790_v41 = vadd.f32 %v1789_v13, %v1788_v12  ;;  %v1689_v61 = vrot.slane %v1688_v62, 4 }
 0x259   : > { %v1800_v22 = vadd.f32 %v1799_v32, %v1798_v33  ;;  %v1699_v23 = vrot.slane %v1698_v51, 4  ;;  %v1709_v21 = vrot.slane %v1708_v8, 4  ;;  %v1719_v57 = vrot.slane %v1718_v4, 4 }
 0x25a   : > { %v1771_v10 = vrot.slane %v1770_v9, 2  ;;  %v1781_v7 = vrot.slane %v1780_v43, 2  ;;  %v1791_v1 = vrot.slane %v1790_v41, 2  ;;  %v1690_v60 = vadd.f32 %v1689_v61, %v1688_v62 }
 0x25b   : > { %v1801_v35 = vrot.slane %v1800_v22, 2  ;;  %v1700_v0 = vadd.f32 %v1699_v23, %v1698_v51  ;;  %v1710_v33 = vadd.f32 %v1709_v21, %v1708_v8  ;;  %v1720_v52 = vadd.f32 %v1719_v57, %v1718_v4 }
 0x25c   : > { %v1772_v63 = vadd.f32 %v1771_v10, %v1770_v9  ;;  %v1782_v49 = vadd.f32 %v1781_v7, %v1780_v43  ;;  %v1792_v46 = vadd.f32 %v1791_v1, %v1790_v41  ;;  %v1691_v20 = vrot.slane %v1690_v60, 2  ;;  %v1376_v7 = vpop.f32.mrf.mxu2 }
 0x25d   : > { %v1802_v12 = vadd.f32 %v1801_v35, %v1800_v22  ;;  %v1701_v42 = vrot.slane %v1700_v0, 2  ;;  %v1711_v48 = vrot.slane %v1710_v33, 2  ;;  %v1721_v41 = vrot.slane %v1720_v52, 2 }
 0x25e   : > { %v1773_v24 = vrot.slane %v1772_v63, 1  ;;  %v1783_v16 = vrot.slane %v1782_v49, 1  ;;  %v1793_v3 = vrot.slane %v1792_v46, 1  ;;  %v1692_v13 = vadd.f32 %v1691_v20, %v1690_v60  ;;  %v1453_v20 = vpop.f32.mrf.mxu3 }
 0x25f   : > { %v1803_v50 = vrot.slane %v1802_v12, 1  ;;  %v1702_v32 = vadd.f32 %v1701_v42, %v1700_v0  ;;  %v1712_v43 = vadd.f32 %v1711_v48, %v1710_v33  ;;  %v1896_v22 = vlaneseq }
 0x260   : > { %v1774_v62 = vadd.f32 %v1773_v24, %v1772_v63  ;;  %v1784_v51 = vadd.f32 %v1783_v16, %v1782_v49  ;;  %v1794_v61 = vadd.f32 %v1793_v3, %v1792_v46  ;;  %v1693_v17 = vrot.slane %v1692_v13, 1 }
 0x261   : > { %v1703_v9 = vrot.slane %v1702_v32, 1  ;;  %v1804_v59 = vadd.f32 %v1803_v50, %v1802_v12  ;;  %v1713_v0 = vrot.slane %v1712_v43, 1  ;;  %v1722_v35 = vadd.f32 %v1721_v41, %v1720_v52 }
 0x262   : > { %v1870_v21 = vsel %vm1861_vm3, %v1784_v51, %v1774_v62  ;;  %v1694_v8 = vadd.f32 %v1693_v17, %v1692_v13  ;;  %v1897_v60 = vshrl.u32 %v1896_v22, 7  ;;  %v1377_v46 = vadd.f32 %v3041_v31, %v1376_v7 }
 0x263   : > { %v1871_v23 = vsel %vm1863_vm4, %v1794_v61, %v1870_v21  ;;  %v1704_v10 = vadd.f32 %v1703_v9, %v1702_v32  ;;  %v1714_v48 = vadd.f32 %v1713_v0, %v1712_v43  ;;  %v1723_v49 = vrot.slane %v1722_v35, 1 }
 0x264   : > { %v1872_v1 = vsel %vm1865_vm5, %v1804_v59, %v1871_v23  ;;  %2105 = vset.pattern.permute.xlu2 %v1897_v60  ;;  %v1454_v57 = vadd.f32 %v1453_v20, %v1377_v46  ;;  %v3405_v7 = vmax.f32 %v3198_v56, 0.0  ;;  %v2109_v60 = vld [vmem:[%s3397_s7] ss:$0 sm:$0xff]  ;;  %v3307_v46 = vmul.f32 %v3251_v26, %v3057_v44 }
 0x265   : > { %v1887_v4 = vsel %vm1880_vm6, %v1872_v1, 0.0  ;;  %v1862_v63 = vsel %vm1861_vm3, %v1704_v10, %v1694_v8  ;;  %v1724_v42 = vadd.f32 %v1723_v49, %v1722_v35 }
 0x266   : > { %1888 = vadd.xlane.f32.xlu2 %v1887_v4  ;;  %v1864_v12 = vsel %vm1863_vm4, %v1714_v48, %v1862_v63  ;;  %v1481_v3 = vmax.f32 %v1454_v57, 0.0  ;;  %v1456_v13 = vpop.f32.mrf.mxu3 }
 0x267   : > { %v1866_v33 = vsel %vm1865_vm5, %v1724_v42, %v1864_v12 }
 0x268   : > { %v1881_v52 = vsel %vm1880_vm6, %v1866_v33, 0.0  ;;  %v1536_v51 = vrot.slane %v1481_v3, 1 }
 0x269   : > { %1882 = vadd.xlane.f32.xlu0 %v1881_v52  ;;  %v3321_v52 = vmul.f32 %v3263_v47, %v3057_v44 }
 0x26a   : > { %v1537_v59 = vsel %vm446_vm0, %v3230_v25, %v1536_v51 }
 0x26b   : > { %v1580_v1 = vmax.f32 %v3405_v7, %v1537_v59 }
 0x26d   : > { %v1346_v24 = vpop.f32.mrf.mxu0  ;;  %v1665_v33 = vmul.f32 %v3080_v53, %v1580_v1  ;;  %v1670_v57 = vmul.f32 %v3085_v11, %v1580_v1 }
 0x26e   : > { %v1347_v16 = vadd.f32 %v3041_v31, %v1346_v24  ;;  %v1459_v0 = vpop.f32.mrf.mxu3  ;;  %v1675_v24 = vmul.f32 %v3090_v40, %v1580_v1 }
 0x270   : > { %v1424_v50 = vadd.f32 %v3024_v55, %v1347_v16 }
 0x272   : > { %v1471_v32 = vmax.f32 %v1424_v50, 0.0 }
 0x273   : > { %v1379_v62 = vpop.f32.mrf.mxu2 }
 0x274   : > { %v1380_v61 = vadd.f32 %v3041_v31, %v1379_v62  ;;  %v1516_v9 = vrot.slane %v1471_v32, 1 }
 0x275   : > { %v1349_v17 = vpop.f32.mrf.mxu0 }
 0x276   : > { %v1457_v43 = vadd.f32 %v1456_v13, %v1380_v61  ;;  %v1350_v41 = vadd.f32 %v3041_v31, %v1349_v17  ;;  %v1517_v55 = vsel %vm446_vm0, %v3238_v15, %v1516_v9  ;;  %v3406_v15 = vmax.f32 %v3216_v54, 0.0 }
 0x277   : > { %v3317_v54 = vmul.f32 %v3258_v39, %v3057_v44  ;;  %v1680_v13 = vmul.f32 %v3108_v2, %v1580_v1 }
 0x278   : > { %v1482_v21 = vmax.f32 %v1457_v43, 0.0  ;;  %v1427_v23 = vadd.f32 %v3030_v19, %v1350_v41  ;;  %v3301_v19 = vmul.f32 %v3246_v37, %v3057_v44  ;;  %v1570_v63 = vmax.f32 %v3406_v15, %v1517_v55 }
 0x27a   : > { %v1538_v8 = vrot.slane %v1482_v21, 1  ;;  %v1472_v10 = vmax.f32 %v1427_v23, 0.0  ;;  %v1625_v62 = vmul.f32 %v3080_v53, %v1570_v63  ;;  %v1630_v17 = vmul.f32 %v3085_v11, %v1570_v63 }
 0x27b   : > { %v1382_v35 = vpop.f32.mrf.mxu2  ;;  %v1635_v44 = vmul.f32 %v3090_v40, %v1570_v63  ;;  %v1640_v53 = vmul.f32 %v3108_v2, %v1570_v63  ;;  %v1462_v40 = vpop.f32.mrf.mxu3 }
 0x27c   : > { %v1539_v4 = vsel %vm446_vm0, %v1536_v51, %v1538_v8  ;;  %v1518_v25 = vrot.slane %v1472_v10, 1  ;;  %v1383_v48 = vadd.f32 %v3041_v31, %v1382_v35 }
 0x27d   : > { %v1581_v49 = vmax.f32 %v1481_v3, %v1539_v4  ;;  %v1352_v56 = vpop.f32.mrf.mxu0 }
 0x27e   : > { %v1519_v12 = vsel %vm446_vm0, %v1516_v9, %v1518_v25  ;;  %v3310_v20 = vadd.f32 %v1459_v0, %v1383_v48  ;;  %v1353_v42 = vadd.f32 %v3041_v31, %v1352_v56  ;;  %1900 = vperm.xlu2 %2105, %v2109_v60  }
 0x27f   : > { %v1571_v16 = vmax.f32 %v1471_v32, %v1519_v12  ;;  %v1666_v51 = vmul.f32 %v3096_v38, %v1581_v49  ;;  %v1671_v61 = vmul.f32 %v3101_v27, %v1581_v49  ;;  %v1676_v9 = vmul.f32 %v3114_v45, %v1581_v49 }
 0x280   : > { %v1483_v3 = vmax.f32 %v3310_v20, 0.0  ;;  %v1430_v50 = vadd.f32 %v3036_v58, %v1353_v42  ;;  %v1681_v32 = vmul.f32 %v3119_v18, %v1581_v49 }
 0x281   : > { %v1626_v43 = vmul.f32 %v3096_v38, %v1571_v16  ;;  %v1631_v58 = vmul.f32 %v3101_v27, %v1571_v16  ;;  %v1636_v55 = vmul.f32 %v3114_v45, %v1571_v16  ;;  %v1641_v0 = vmul.f32 %v3119_v18, %v1571_v16 }
 0x282   : > { %v1540_v41 = vrot.slane %v1483_v3, 1  ;;  %v1473_v59 = vmax.f32 %v1430_v50, 0.0  ;;  %v1805_v7 = vadd.f32 %v1666_v51, %v1665_v33  ;;  %v1815_v1 = vadd.f32 %v1671_v61, %v1670_v57 }
 0x283   : > { %v1385_v23 = vpop.f32.mrf.mxu2  ;;  %v1825_v27 = vadd.f32 %v1676_v9, %v1675_v24  ;;  %v1835_v48 = vadd.f32 %v1681_v32, %v1680_v13  ;;  %v1725_v45 = vadd.f32 %v1626_v43, %v1625_v62  ;;  %v1735_v63 = vadd.f32 %v1631_v58, %v1630_v17  ;;  %v3408_v17 = vld [vmem:[#allocation2_spill] sm:$0xff] }
 0x284   : > { %v1386_v11 = vadd.f32 %v3041_v31, %v1385_v23  ;;  %v1541_v35 = vsel %vm446_vm0, %v1538_v8, %v1540_v41  ;;  %v1520_v60 = vrot.slane %v1473_v59, 1  ;;  %v3407_v18 = vmov 0  }
 0x285   : > { %v1582_v38 = vmax.f32 %v1482_v21, %v1541_v35  ;;  %v1745_v56 = vadd.f32 %v1636_v55, %v1635_v44  ;;  %v1755_v12 = vadd.f32 %v1641_v0, %v1640_v53 }
 0x286   : > { %v1463_v4 = vadd.f32 %v1462_v40, %v1386_v11  ;;  %v1521_v15 = vsel %vm446_vm0, %v1518_v25, %v1520_v60  ;;  %v1523_v2 = vsel %vm446_vm0, %v1520_v60, %v3048_v29  ;;  %2106 = vset.pattern.permute.xlu2 %v3407_v18 }
 0x287   : > { %v1667_v31 = vmul.f32 %v3144_v6, %v1582_v38  ;;  %v1572_v49 = vmax.f32 %v1472_v10, %v1521_v15  ;;  %v1672_v8 = vmul.f32 %v3149_v36, %v1582_v38  ;;  %v1677_v21 = vmul.f32 %v3154_v30, %v1582_v38 }
 0x288   : > { %v1573_v20 = vmax.f32 %v1473_v59, %v1523_v2  ;;  %v1484_v42 = vmax.f32 %v1463_v4, 0.0  ;;  %v1682_v57 = vmul.f32 %v3159_v5, %v1582_v38 }
 0x289   : > { %v1627_v25 = vmul.f32 %v3144_v6, %v1572_v49  ;;  %v1632_v33 = vmul.f32 %v3149_v36, %v1572_v49  ;;  %v1637_v29 = vmul.f32 %v3154_v30, %v1572_v49  ;;  %v1806_v50 = vadd.f32 %v1805_v7, %v1667_v31 }
 0x28a   : > { %v1628_v24 = vmul.f32 %v3193_v28, %v1573_v20  ;;  %v1633_v10 = vmul.f32 %v3204_v34, %v1573_v20  ;;  %v1638_v16 = vmul.f32 %v3211_v14, %v1573_v20  ;;  %v1542_v61 = vrot.slane %v1484_v42, 1 }
 0x28b   : > { %v1726_v13 = vadd.f32 %v1725_v45, %v1627_v25  ;;  %v1736_v62 = vadd.f32 %v1735_v63, %v1632_v33  ;;  %v1746_v51 = vadd.f32 %v1745_v56, %v1637_v29  ;;  %v1643_v44 = vmul.f32 %v3408_v17, %v1573_v20 }
 0x28c   : > { %v1816_v6 = vadd.f32 %v1815_v1, %v1672_v8  ;;  %v1642_v36 = vmul.f32 %v3159_v5, %v1572_v49  ;;  %v1826_v9 = vadd.f32 %v1825_v27, %v1677_v21  ;;  %v1543_v58 = vsel %vm446_vm0, %v1540_v41, %v1542_v61 }
 0x28d   : > { %v1727_v30 = vadd.f32 %v1726_v13, %v1628_v24  ;;  %v1737_v32 = vadd.f32 %v1736_v62, %v1633_v10  ;;  %v1747_v43 = vadd.f32 %v1746_v51, %v1638_v16  ;;  %v1564_v59 = vsel %vm446_vm0, %v1542_v61, 0.0 }
 0x28e   : > { %v1583_v23 = vmax.f32 %v1483_v3, %v1543_v58  ;;  %v1756_v53 = vadd.f32 %v1755_v12, %v1642_v36  ;;  %v1836_v55 = vadd.f32 %v1835_v48, %v1682_v57  ;;  %v1584_v0 = vmax.f32 %v1484_v42, %v1564_v59 }
 0x28f   : > { %v1728_v11 = vadd.f32 %v1727_v30, %v3301_v19  ;;  %v1738_v40 = vadd.f32 %v1737_v32, %v3307_v46  ;;  %v1748_v7 = vadd.f32 %v1747_v43, %v3317_v54 }
 0x290   : > { %v1668_v5 = vmul.f32 %v3193_v28, %v1583_v23  ;;  %v1673_v1 = vmul.f32 %v3204_v34, %v1583_v23  ;;  %v1757_v35 = vadd.f32 %v1756_v53, %v1643_v44  ;;  %v1678_v60 = vmul.f32 %v3211_v14, %v1583_v23 }
 0x291   : > { %v1669_v41 = vmul.f32 %v3246_v37, %v1584_v0  ;;  %v1674_v3 = vmul.f32 %v3251_v26, %v1584_v0  ;;  %v1679_v38 = vmul.f32 %v3258_v39, %v1584_v0  ;;  %v1684_v4 = vmul.f32 %v3263_v47, %v1584_v0 }
 0x292   : > { %v1807_v19 = vadd.f32 %v1806_v50, %v1668_v5  ;;  %v1817_v27 = vadd.f32 %v1816_v6, %v1673_v1  ;;  %v1729_v46 = vrot.slane %v1728_v11, 4  ;;  %v1739_v48 = vrot.slane %v1738_v40, 4 }
 0x293   : > { %v1749_v54 = vrot.slane %v1748_v7, 4  ;;  %v1758_v28 = vadd.f32 %v1757_v35, %v3321_v52  ;;  %v1683_v34 = vmul.f32 %v3408_v17, %v1583_v23  ;;  %v1827_v15 = vadd.f32 %v1826_v9, %v1678_v60 }
 0x294   : > { %v1808_v2 = vadd.f32 %v1807_v19, %v1669_v41  ;;  %v1818_v14 = vadd.f32 %v1817_v27, %v1674_v3  ;;  %v1730_v45 = vadd.f32 %v1729_v46, %v1728_v11  ;;  %v1740_v37 = vadd.f32 %v1739_v48, %v1738_v40 }
 0x295   : > { %v1750_v63 = vadd.f32 %v1749_v54, %v1748_v7  ;;  %v1759_v26 = vrot.slane %v1758_v28, 4  ;;  %v1828_v18 = vadd.f32 %v1827_v15, %v1679_v38  ;;  %v1837_v39 = vadd.f32 %v1836_v55, %v1683_v34 }
 0x296   : > { %v1731_v31 = vrot.slane %v1730_v45, 2  ;;  %v1741_v47 = vrot.slane %v1740_v37, 2  ;;  %v1809_v49 = vrot.slane %v1808_v2, 4  ;;  %v1819_v56 = vrot.slane %v1818_v14, 4 }
 0x297   : > { %v1751_v12 = vrot.slane %v1750_v63, 2  ;;  %v1760_v8 = vadd.f32 %v1759_v26, %v1758_v28  ;;  %v1829_v21 = vrot.slane %v1828_v18, 4  ;;  %v1838_v20 = vadd.f32 %v1837_v39, %v1684_v4 }
 0x298   : > { %v1732_v52 = vadd.f32 %v1731_v31, %v1730_v45  ;;  %v1742_v42 = vadd.f32 %v1741_v47, %v1740_v37  ;;  %v1810_v25 = vadd.f32 %v1809_v49, %v1808_v2  ;;  %v1820_v33 = vadd.f32 %v1819_v56, %v1818_v14 }
 0x299   : > { %v1752_v29 = vadd.f32 %v1751_v12, %v1750_v63  ;;  %v1761_v57 = vrot.slane %v1760_v8, 2  ;;  %v1830_v24 = vadd.f32 %v1829_v21, %v1828_v18  ;;  %v1839_v10 = vrot.slane %v1838_v20, 4 }
 0x29a   : > { %v1733_v16 = vrot.slane %v1732_v52, 1  ;;  %v1743_v50 = vrot.slane %v1742_v42, 1  ;;  %v1811_v13 = vrot.slane %v1810_v25, 2  ;;  %v1821_v62 = vrot.slane %v1820_v33, 2 }
 0x29b   : > { %v1753_v51 = vrot.slane %v1752_v29, 1  ;;  %v1762_v61 = vadd.f32 %v1761_v57, %v1760_v8  ;;  %v1831_v17 = vrot.slane %v1830_v24, 2  ;;  %v1840_v44 = vadd.f32 %v1839_v10, %v1838_v20 }
 0x29c   : > { %v1734_v6 = vadd.f32 %v1733_v16, %v1732_v52  ;;  %v1744_v36 = vadd.f32 %v1743_v50, %v1742_v42  ;;  %v1812_v9 = vadd.f32 %v1811_v13, %v1810_v25  ;;  %v1822_v30 = vadd.f32 %v1821_v62, %v1820_v33 }
 0x29d   : > { %v1754_v32 = vadd.f32 %v1753_v51, %v1752_v29  ;;  %v1763_v43 = vrot.slane %v1762_v61, 1  ;;  %v1832_v58 = vadd.f32 %v1831_v17, %v1830_v24  ;;  %v1841_v59 = vrot.slane %v1840_v44, 2 }
 0x29e   : > { %v1867_v23 = vsel %vm1861_vm3, %v1744_v36, %v1734_v6  ;;  %v1813_v53 = vrot.slane %v1812_v9, 1  ;;  %v1823_v55 = vrot.slane %v1822_v30, 1  ;;  %v1924_v26 = vand.u32 127, %v1896_v22 }
 0x29f   : > { %v1764_v0 = vadd.f32 %v1763_v43, %v1762_v61  ;;  %v1868_v11 = vsel %vm1863_vm4, %v1754_v32, %v1867_v23  ;;  %v1833_v40 = vrot.slane %v1832_v58, 1  ;;  %v1842_v7 = vadd.f32 %v1841_v59, %v1840_v44 }
 0x2a0   : > { %v1814_v5 = vadd.f32 %v1813_v53, %v1812_v9  ;;  %v1824_v1 = vadd.f32 %v1823_v55, %v1822_v30 }
 0x2a1   : > { %v1869_v35 = vsel %vm1865_vm5, %v1764_v0, %v1868_v11  ;;  %v1834_v60 = vadd.f32 %v1833_v40, %v1832_v58  ;;  %v1843_v41 = vrot.slane %v1842_v7, 1 }
 0x2a2   : > { %v1884_v3 = vsel %vm1880_vm6, %v1869_v35, 0.0  ;;  %v1873_v38 = vsel %vm1861_vm3, %v1824_v1, %v1814_v5 }
 0x2a3   : > { %1885 = vadd.xlane.f32.xlu1 %v1884_v3  ;;  %v1844_v4 = vadd.f32 %v1843_v41, %v1842_v7  ;;  %v1874_v19 = vsel %vm1863_vm4, %v1834_v60, %v1873_v38 }
 0x2a5   : > { %v1875_v27 = vsel %vm1865_vm5, %v1844_v4, %v1874_v19 }
 0x2a6   : > { %v1890_v46 = vsel %vm1880_vm6, %v1875_v27, 0.0 }
 0x2a7   : > { %1891 = vadd.xlane.f32.xlu0 %v1890_v46 }
 0x2d9   : > { %v1889_v48 = vpop.xlane.xlu2 %1888 }
 0x2dc   : > { %v1883_v54 = vpop.xlane.xlu0 %1882 }
 0x2e1   : > { %v1901_v28 = vpop.permute.xlu2 %1900 }
 0x2e2   : > { %v1905_v34 = vadd.f32 %v1901_v28, %v1889_v48  ;;  %v1903_v15 = vadd.f32 %v1901_v28, %v1883_v54 }
 0x2e4   : > { %1918 = vperm.xlu2 %2106, %v1905_v34   ;;  %1912 = vperm.xlu1 %2053, %v1903_v15  }
 0x316   : > { %v1886_v2 = vpop.xlane.xlu1 %1885 }
 0x317   : > { %v1904_v14 = vadd.f32 %v1901_v28, %v1886_v2 }
 0x319   : > { %1915 = vperm.xlu0 %2052, %v1904_v14  }
 0x31a   : > { %v1892_v45 = vpop.xlane.xlu0 %1891 }
 0x31b   : > { %v1906_v37 = vadd.f32 %v1901_v28, %v1892_v45 }
 0x31d   : > { %1921 = vperm.xlu1 %2053, %v1906_v37  }
 0x33e   : > { %v1919_v39 = vpop.permute.xlu2 %1918 }
 0x33f   : > { %v1927_v56 = vperm.slane %v1919_v39, %v1924_v26 }
 0x356   : > { %v1913_v63 = vpop.permute.xlu1 %1912 }
 0x357   : > { %v1925_v31 = vperm.slane %v1913_v63, %v1924_v26 }
 0x38b   : > { %v1916_v18 = vpop.permute.xlu0 %1915 }
 0x38c   : > { %v1926_v47 = vperm.slane %v1916_v18, %v1924_v26 }
 0x38e   : > { %v1929_v49 = vsel %vm1861_vm3, %v1926_v47, %v1925_v31 }
 0x38f   : > { %v1922_v12 = vpop.permute.xlu1 %1921  ;;  %v1930_v21 = vsel %vm1863_vm4, %v1927_v56, %v1929_v49 }
 0x390   : > { %v1928_v8 = vperm.slane %v1922_v12, %v1924_v26 }
 0x392   : > { %v1931_v20 = vsel %vm1865_vm5, %v1928_v8, %v1930_v21 }
 0x393   : > { %1934 = vst.msk [vmem:[%s303_s12] sm:$0xf] %vm1933_vm7, %v1931_v20 }
 0x394 PF: > { %s18_s27 = sadd.s32 1, %s2116_s27  }
 0x395   : > { %p15_p4 = scmp.ge.s32.totalorder %s18_s27, 4  }
 0x397   :  { %17 = sbr.rel (!%p15_p4) target bundleno = 1 (0x1), region = 82 }

</bundles_post_ra>
